<compile_context>
chip_gen: v6e
topology: v6e:2x2x1
jax: 0.10.0
libtpu: 0.0.40
codegen_flags: <defaults>
</compile_context>

<pallas_src>
import functools
import math

import jax
import jax.numpy as jnp
from jax.experimental import pallas as pl
from jax.experimental.pallas import tpu as pltpu


# ----------------------------------------------------------------------------- kernel

def decoder_layer_kernel(
    x_ref, enc_ref, tgt_mask_ref, src_mask_ref,
    w_qkv_s_ref, b_qkv_s_ref, w_o_s_ref, b_o_s_ref,
    w_q_c_ref, b_q_c_ref, w_kv_c_ref, b_kv_c_ref, w_o_c_ref, b_o_c_ref,
    ln1_g_ref, ln1_b_ref, ln2_g_ref, ln2_b_ref,
    w1_ref, b1_ref, w2_ref, b2_ref, ln3_g_ref, ln3_b_ref,
    o_ref, *, num_heads, eps):
    """One batch element of the full decoder layer, entirely in VMEM."""
    x = x_ref[0]          # (St, D)
    enc = enc_ref[0]      # (Ss, D)
    D = x.shape[-1]
    d_k = D // num_heads
    scale = 1.0 / math.sqrt(d_k)

    def mha(q, k, v, mask):
        # q: (Sq, D), k/v: (Sk, D), mask: (Sq, Sk) int32.  Static unrolled head loop;
        # all slices are lane slices of VMEM values -> no HBM layout traffic.
        outs = []
        for h in range(num_heads):
            sl = slice(h * d_k, (h + 1) * d_k)
            q_h, k_h, v_h = q[:, sl], k[:, sl], v[:, sl]
            s = jnp.dot(q_h, k_h.T, preferred_element_type=jnp.float32) * scale
            s = jnp.where(mask == 0, -1e9, s)
            s = s - jnp.max(s, axis=-1, keepdims=True)
            e = jnp.exp(s)
            p = e * pl.reciprocal(jnp.sum(e, axis=-1, keepdims=True), approx=True)
            outs.append(jnp.dot(p, v_h, preferred_element_type=jnp.float32))
        return jnp.concatenate(outs, axis=-1)          # (Sq, D) lane-dense

    def add_ln(a, b, g, bias):
        z = a + b
        mean = jnp.mean(z, axis=-1, keepdims=True)
        var = jnp.mean((z - mean) * (z - mean), axis=-1, keepdims=True)
        return (z - mean) * jax.lax.rsqrt(var + eps) * g + bias

    # ---- self-attention sublayer (fused QKV projection) ----
    qkv = jnp.dot(x, w_qkv_s_ref[...],
                  preferred_element_type=jnp.float32) + b_qkv_s_ref[...]
    attn = mha(qkv[:, :D], qkv[:, D:2 * D], qkv[:, 2 * D:], tgt_mask_ref[...])
    sa = jnp.dot(attn, w_o_s_ref[...],
                 preferred_element_type=jnp.float32) + b_o_s_ref[...]
    x1 = add_ln(x, sa, ln1_g_ref[...], ln1_b_ref[...])

    # ---- cross-attention sublayer (fused KV projection over encoder output) ----
    q = jnp.dot(x1, w_q_c_ref[...],
                preferred_element_type=jnp.float32) + b_q_c_ref[...]
    kv = jnp.dot(enc, w_kv_c_ref[...],
                 preferred_element_type=jnp.float32) + b_kv_c_ref[...]
    attn = mha(q, kv[:, :D], kv[:, D:], src_mask_ref[...])
    ca = jnp.dot(attn, w_o_c_ref[...],
                 preferred_element_type=jnp.float32) + b_o_c_ref[...]
    x2 = add_ln(x1, ca, ln2_g_ref[...], ln2_b_ref[...])

    # ---- feed-forward sublayer (dropout = identity) ----
    hidden = jnp.maximum(
        jnp.dot(x2, w1_ref[...], preferred_element_type=jnp.float32) + b1_ref[...],
        0.0)
    ff = jnp.dot(hidden, w2_ref[...],
                 preferred_element_type=jnp.float32) + b2_ref[...]
    o_ref[0] = add_ln(x2, ff, ln3_g_ref[...], ln3_b_ref[...])


# ---------------------------------------------------------------------------- wrapper

def _full_spec(*shape):
    rank = len(shape)
    return pl.BlockSpec(shape, lambda i, _r=rank: (0,) * _r)


def _prep_mask(mask, sq, sk):
    # masks in the reference are broadcastable (1, 1, Sq, Sk); present a 2D int32 tile.
    m = jnp.broadcast_to(jnp.asarray(mask), (1, 1, sq, sk)).reshape(sq, sk)
    return m.astype(jnp.int32)


def decoder_layer(x, enc_output, src_mask, tgt_mask, params, num_heads, eps=1e-5):
    B, St, D = x.shape
    Ss = enc_output.shape[1]
    Dff = params["ffn_W1"].shape[1]

    sa = params["self_attn"]
    ca = params["cross_attn"]

    # fuse QKV (self) and KV (cross) projection weights
    w_qkv_s = jnp.concatenate([sa["W_q"], sa["W_k"], sa["W_v"]], axis=1)       # (D, 3D)
    b_qkv_s = jnp.concatenate([sa["b_q"], sa["b_k"], sa["b_v"]]).reshape(1, 3 * D)
    w_kv_c = jnp.concatenate([ca["W_k"], ca["W_v"]], axis=1)                   # (D, 2D)
    b_kv_c = jnp.concatenate([ca["b_k"], ca["b_v"]]).reshape(1, 2 * D)

    tgt_m = _prep_mask(tgt_mask, St, St)
    src_m = _prep_mask(src_mask, St, Ss)

    kern = functools.partial(decoder_layer_kernel, num_heads=num_heads, eps=eps)

    in_specs = [
        pl.BlockSpec((1, St, D), lambda i: (i, 0, 0)),    # x (per batch)
        pl.BlockSpec((1, Ss, D), lambda i: (i, 0, 0)),    # enc_output (per batch)
        _full_spec(St, St),                               # tgt mask
        _full_spec(St, Ss),                               # src mask
        _full_spec(D, 3 * D), _full_spec(1, 3 * D),       # self-attn QKV
        _full_spec(D, D), _full_spec(1, D),               # self-attn out-proj
        _full_spec(D, D), _full_spec(1, D),               # cross-attn Q
        _full_spec(D, 2 * D), _full_spec(1, 2 * D),       # cross-attn KV
        _full_spec(D, D), _full_spec(1, D),               # cross-attn out-proj
        _full_spec(1, D), _full_spec(1, D),               # ln1
        _full_spec(1, D), _full_spec(1, D),               # ln2
        _full_spec(D, Dff), _full_spec(1, Dff),           # ffn linear1
        _full_spec(Dff, D), _full_spec(1, D),             # ffn linear2
        _full_spec(1, D), _full_spec(1, D),               # ln3
    ]

    return pl.pallas_call(
        kern,
        out_shape=jax.ShapeDtypeStruct((B, St, D), jnp.float32),
        grid=(B,),
        in_specs=in_specs,
        out_specs=pl.BlockSpec((1, St, D), lambda i: (i, 0, 0)),
        compiler_params=pltpu.CompilerParams(dimension_semantics=("parallel",)),
    )(
        x, enc_output, tgt_m, src_m,
        w_qkv_s, b_qkv_s, sa["W_o"], sa["b_o"].reshape(1, D),
        ca["W_q"], ca["b_q"].reshape(1, D), w_kv_c, b_kv_c,
        ca["W_o"], ca["b_o"].reshape(1, D),
        params["ln1_g"].reshape(1, D), params["ln1_b"].reshape(1, D),
        params["ln2_g"].reshape(1, D), params["ln2_b"].reshape(1, D),
        params["ffn_W1"], params["ffn_b1"].reshape(1, Dff),
        params["ffn_W2"], params["ffn_b2"].reshape(1, D),
        params["ln3_g"].reshape(1, D), params["ln3_b"].reshape(1, D),
    )


# ----------------------------------------------------------------------- pure-JAX ref

def reference_decoder_layer(x, enc, src_mask, tgt_mask, params, num_heads, eps=1e-5):
    def mha(xq, xkv, mask, p):
        B, Sq, D = xq.shape
        Sk = xkv.shape[1]
        dk = D // num_heads
        q = xq @ p["W_q"] + p["b_q"]
        k = xkv @ p["W_k"] + p["b_k"]
        v = xkv @ p["W_v"] + p["b_v"]
        q = q.reshape(B, Sq, num_heads, dk).transpose(0, 2, 1, 3)
        k = k.reshape(B, Sk, num_heads, dk).transpose(0, 2, 1, 3)
        v = v.reshape(B, Sk, num_heads, dk).transpose(0, 2, 1, 3)
        s = jnp.einsum("bhqd,bhkd->bhqk", q, k) / math.sqrt(dk)
        s = jnp.where(mask == 0, -1e9, s)
        probs = jax.nn.softmax(s, axis=-1)
        o = jnp.einsum("bhqk,bhkd->bhqd", probs, v)
        o = o.transpose(0, 2, 1, 3).reshape(B, Sq, D)
        return o @ p["W_o"] + p["b_o"]

    def ln(z, g, b):
        m = z.mean(-1, keepdims=True)
        v = ((z - m) ** 2).mean(-1, keepdims=True)
        return (z - m) * jax.lax.rsqrt(v + eps) * g + b

    x1 = ln(x + mha(x, x, tgt_mask, params["self_attn"]),
            params["ln1_g"], params["ln1_b"])
    x2 = ln(x1 + mha(x1, enc, src_mask, params["cross_attn"]),
            params["ln2_g"], params["ln2_b"])
    h = jnp.maximum(x2 @ params["ffn_W1"] + params["ffn_b1"], 0.0)
    ff = h @ params["ffn_W2"] + params["ffn_b2"]
    return ln(x2 + ff, params["ln3_g"], params["ln3_b"])


# -------------------------------------------------------------------------------- main

def make_params(key, d_model, d_ff, num_heads):
    keys = jax.random.split(key, 20)
    ki = iter(range(20))

    def lin(d_in, d_out):
        w = jax.random.normal(keys[next(ki)], (d_in, d_out), jnp.float32) * (1.0 / math.sqrt(d_in))
        b = jax.random.normal(keys[next(ki)], (d_out,), jnp.float32) * 0.01
        return w, b

    def attn_params():
        p = {}
        for name in ("q", "k", "v", "o"):
            w, b = lin(d_model, d_model)
            p[f"W_{name}"] = w
            p[f"b_{name}"] = b
        return p

    params = {
        "self_attn": attn_params(),
        "cross_attn": attn_params(),
    }
    w1, b1 = lin(d_model, d_ff)
    w2, b2 = lin(d_ff, d_model)
    params.update({
        "ffn_W1": w1, "ffn_b1": b1, "ffn_W2": w2, "ffn_b2": b2,
        "ln1_g": jnp.ones((d_model,), jnp.float32), "ln1_b": jnp.zeros((d_model,), jnp.float32),
        "ln2_g": jnp.ones((d_model,), jnp.float32), "ln2_b": jnp.zeros((d_model,), jnp.float32),
        "ln3_g": jnp.ones((d_model,), jnp.float32), "ln3_b": jnp.zeros((d_model,), jnp.float32),
    })
    return params


if __name__ == "__main__":
    B, S_tgt, S_src = 2, 8, 8
    d_model, num_heads, d_ff = 32, 4, 64

    key = jax.random.PRNGKey(0)
    k_x, k_enc, k_p = jax.random.split(key, 3)

    x = jax.random.normal(k_x, (B, S_tgt, d_model), jnp.float32)
    enc_output = jax.random.normal(k_enc, (B, S_src, d_model), jnp.float32)

    # tgt_mask: causal (1,1,S_tgt,S_tgt); src_mask: all ones (1,1,S_tgt,S_src)
    tgt_mask = jnp.tril(jnp.ones((S_tgt, S_tgt), jnp.int32)).reshape(1, 1, S_tgt, S_tgt)
    src_mask = jnp.ones((1, 1, S_tgt, S_src), jnp.int32)

    params = make_params(k_p, d_model, d_ff, num_heads)

    out = decoder_layer(x, enc_output, src_mask, tgt_mask, params, num_heads)
    out = jax.block_until_ready(out)

    ref = reference_decoder_layer(x, enc_output, src_mask, tgt_mask, params, num_heads)
    assert out.shape == (B, S_tgt, d_model)
    assert bool(jnp.all(jnp.isfinite(out)))
    # approx reciprocal (EUP vrcp) perturbs numerics at ~1e-3 relative; generous tol
    assert bool(jnp.max(jnp.abs(out - ref)) < 5e-2), float(jnp.max(jnp.abs(out - ref)))
    print("KERNEL_OK")
</pallas_src>

<mosaic_0001>
module attributes {stable_mosaic.version = 11 : i64} {
  func.func @decoder_layer_kernel(%arg0: i32, %arg1: memref<1x8x32xf32, #tpu.memory_space<vmem>>, %arg2: memref<1x8x32xf32, #tpu.memory_space<vmem>>, %arg3: memref<8x8xi32, #tpu.memory_space<vmem>>, %arg4: memref<8x8xi32, #tpu.memory_space<vmem>>, %arg5: memref<32x96xf32, #tpu.memory_space<vmem>>, %arg6: memref<1x96xf32, #tpu.memory_space<vmem>>, %arg7: memref<32x32xf32, #tpu.memory_space<vmem>>, %arg8: memref<1x32xf32, #tpu.memory_space<vmem>>, %arg9: memref<32x32xf32, #tpu.memory_space<vmem>>, %arg10: memref<1x32xf32, #tpu.memory_space<vmem>>, %arg11: memref<32x64xf32, #tpu.memory_space<vmem>>, %arg12: memref<1x64xf32, #tpu.memory_space<vmem>>, %arg13: memref<32x32xf32, #tpu.memory_space<vmem>>, %arg14: memref<1x32xf32, #tpu.memory_space<vmem>>, %arg15: memref<1x32xf32, #tpu.memory_space<vmem>>, %arg16: memref<1x32xf32, #tpu.memory_space<vmem>>, %arg17: memref<1x32xf32, #tpu.memory_space<vmem>>, %arg18: memref<1x32xf32, #tpu.memory_space<vmem>>, %arg19: memref<32x64xf32, #tpu.memory_space<vmem>>, %arg20: memref<1x64xf32, #tpu.memory_space<vmem>>, %arg21: memref<64x32xf32, #tpu.memory_space<vmem>>, %arg22: memref<1x32xf32, #tpu.memory_space<vmem>>, %arg23: memref<1x32xf32, #tpu.memory_space<vmem>>, %arg24: memref<1x32xf32, #tpu.memory_space<vmem>>, %arg25: memref<1x8x32xf32, #tpu.memory_space<vmem>>) attributes {dimension_semantics = [#tpu.dimension_semantics<parallel>], iteration_bounds = array<i64: 2>, scalar_prefetch = 0 : i64, scratch_operands = 0 : i64, tpu.core_type = #tpu.core_type<tc>, window_params = [{transform_indices = @transform_0, window_bounds = array<i64: 1, 8, 32>}, {transform_indices = @transform_1, window_bounds = array<i64: 1, 8, 32>}, {pipeline_mode = #tpu.pipeline_mode<synchronous>, transform_indices = @transform_2, window_bounds = array<i64: 8, 8>}, {pipeline_mode = #tpu.pipeline_mode<synchronous>, transform_indices = @transform_3, window_bounds = array<i64: 8, 8>}, {pipeline_mode = #tpu.pipeline_mode<synchronous>, transform_indices = @transform_4, window_bounds = array<i64: 32, 96>}, {pipeline_mode = #tpu.pipeline_mode<synchronous>, transform_indices = @transform_5, window_bounds = array<i64: 1, 96>}, {pipeline_mode = #tpu.pipeline_mode<synchronous>, transform_indices = @transform_6, window_bounds = array<i64: 32, 32>}, {pipeline_mode = #tpu.pipeline_mode<synchronous>, transform_indices = @transform_7, window_bounds = array<i64: 1, 32>}, {pipeline_mode = #tpu.pipeline_mode<synchronous>, transform_indices = @transform_8, window_bounds = array<i64: 32, 32>}, {pipeline_mode = #tpu.pipeline_mode<synchronous>, transform_indices = @transform_9, window_bounds = array<i64: 1, 32>}, {pipeline_mode = #tpu.pipeline_mode<synchronous>, transform_indices = @transform_10, window_bounds = array<i64: 32, 64>}, {pipeline_mode = #tpu.pipeline_mode<synchronous>, transform_indices = @transform_11, window_bounds = array<i64: 1, 64>}, {pipeline_mode = #tpu.pipeline_mode<synchronous>, transform_indices = @transform_12, window_bounds = array<i64: 32, 32>}, {pipeline_mode = #tpu.pipeline_mode<synchronous>, transform_indices = @transform_13, window_bounds = array<i64: 1, 32>}, {pipeline_mode = #tpu.pipeline_mode<synchronous>, transform_indices = @transform_14, window_bounds = array<i64: 1, 32>}, {pipeline_mode = #tpu.pipeline_mode<synchronous>, transform_indices = @transform_15, window_bounds = array<i64: 1, 32>}, {pipeline_mode = #tpu.pipeline_mode<synchronous>, transform_indices = @transform_16, window_bounds = array<i64: 1, 32>}, {pipeline_mode = #tpu.pipeline_mode<synchronous>, transform_indices = @transform_17, window_bounds = array<i64: 1, 32>}, {pipeline_mode = #tpu.pipeline_mode<synchronous>, transform_indices = @transform_18, window_bounds = array<i64: 32, 64>}, {pipeline_mode = #tpu.pipeline_mode<synchronous>, transform_indices = @transform_19, window_bounds = array<i64: 1, 64>}, {pipeline_mode = #tpu.pipeline_mode<synchronous>, transform_indices = @transform_20, window_bounds = array<i64: 64, 32>}, {pipeline_mode = #tpu.pipeline_mode<synchronous>, transform_indices = @transform_21, window_bounds = array<i64: 1, 32>}, {pipeline_mode = #tpu.pipeline_mode<synchronous>, transform_indices = @transform_22, window_bounds = array<i64: 1, 32>}, {pipeline_mode = #tpu.pipeline_mode<synchronous>, transform_indices = @transform_23, window_bounds = array<i64: 1, 32>}, {transform_indices = @transform_24, window_bounds = array<i64: 1, 8, 32>}]} {
    %c0 = arith.constant 0 : index
    %c0_0 = arith.constant 0 : index
    %c0_1 = arith.constant 0 : index
    %0 = vector.load %arg1[%c0, %c0_0, %c0_1] : memref<1x8x32xf32, #tpu.memory_space<vmem>>, vector<1x8x32xf32>
    %1 = vector.shape_cast %0 : vector<1x8x32xf32> to vector<8x32xf32>
    %c0_2 = arith.constant 0 : index
    %c0_3 = arith.constant 0 : index
    %c0_4 = arith.constant 0 : index
    %2 = vector.load %arg2[%c0_2, %c0_3, %c0_4] : memref<1x8x32xf32, #tpu.memory_space<vmem>>, vector<1x8x32xf32>
    %3 = vector.shape_cast %2 : vector<1x8x32xf32> to vector<8x32xf32>
    %c0_5 = arith.constant 0 : index
    %c0_6 = arith.constant 0 : index
    %4 = vector.load %arg5[%c0_5, %c0_6] : memref<32x96xf32, #tpu.memory_space<vmem>>, vector<32x96xf32>
    %cst = arith.constant dense<0.000000e+00> : vector<8x96xf32>
    %5 = tpu.matmul %1, %4, %cst {dimension_numbers = #tpu.dot_dimension_numbers<[1], [0], [0], [1], [0, 0, 1, 1], [], []>} : vector<8x32xf32>, vector<32x96xf32>, vector<8x96xf32> -> vector<8x96xf32>
    %c0_7 = arith.constant 0 : index
    %c0_8 = arith.constant 0 : index
    %6 = vector.load %arg6[%c0_7, %c0_8] : memref<1x96xf32, #tpu.memory_space<vmem>>, vector<1x96xf32>
    %7 = vector.broadcast %6 : vector<1x96xf32> to vector<8x96xf32>
    %8 = arith.addf %5, %7 : vector<8x96xf32>
    %9 = vector.extract_strided_slice %8 {offsets = [0, 0], sizes = [8, 32], strides = [1, 1]} : vector<8x96xf32> to vector<8x32xf32>
    %10 = vector.extract_strided_slice %8 {offsets = [0, 32], sizes = [8, 32], strides = [1, 1]} : vector<8x96xf32> to vector<8x32xf32>
    %11 = vector.extract_strided_slice %8 {offsets = [0, 64], sizes = [8, 32], strides = [1, 1]} : vector<8x96xf32> to vector<8x32xf32>
    %c0_9 = arith.constant 0 : index
    %c0_10 = arith.constant 0 : index
    %12 = vector.load %arg3[%c0_9, %c0_10] : memref<8x8xi32, #tpu.memory_space<vmem>>, vector<8x8xi32>
    %13 = vector.extract_strided_slice %9 {offsets = [0, 0], sizes = [8, 8], strides = [1, 1]} : vector<8x32xf32> to vector<8x8xf32>
    %14 = vector.extract_strided_slice %10 {offsets = [0, 0], sizes = [8, 8], strides = [1, 1]} : vector<8x32xf32> to vector<8x8xf32>
    %15 = vector.extract_strided_slice %11 {offsets = [0, 0], sizes = [8, 8], strides = [1, 1]} : vector<8x32xf32> to vector<8x8xf32>
    %16 = tpu.transpose %14, [1, 0] : vector<8x8xf32> -> vector<8x8xf32>
    %cst_11 = arith.constant dense<0.000000e+00> : vector<8x8xf32>
    %17 = tpu.matmul %13, %16, %cst_11 {dimension_numbers = #tpu.dot_dimension_numbers<[1], [0], [0], [1], [0, 0, 1, 1], [], []>} : vector<8x8xf32>, vector<8x8xf32>, vector<8x8xf32> -> vector<8x8xf32>
    %cst_12 = arith.constant 0.353553385 : f32
    %18 = vector.broadcast %cst_12 : f32 to vector<8x8xf32>
    %19 = arith.mulf %17, %18 : vector<8x8xf32>
    %c0_i32 = arith.constant 0 : i32
    %20 = vector.broadcast %c0_i32 : i32 to vector<8x8xi32>
    %21 = arith.cmpi eq, %12, %20 : vector<8x8xi32>
    %cst_13 = arith.constant -1.000000e+09 : f32
    %22 = vector.broadcast %cst_13 : f32 to vector<8x8xf32>
    %23 = arith.select %21, %22, %19 : vector<8x8xi1>, vector<8x8xf32>
    %cst_14 = arith.constant dense<0xFF800000> : vector<8xf32>
    %24 = vector.multi_reduction <maximumf>, %23, %cst_14 [1] : vector<8x8xf32> to vector<8xf32>
    %25 = vector.shape_cast %24 : vector<8xf32> to vector<8x1xf32>
    %26 = vector.broadcast %25 : vector<8x1xf32> to vector<8x8xf32>
    %27 = arith.subf %23, %26 : vector<8x8xf32>
    %28 = math.exp %27 : vector<8x8xf32>
    %cst_15 = arith.constant dense<0.000000e+00> : vector<8xf32>
    %29 = vector.multi_reduction <add>, %28, %cst_15 [1] : vector<8x8xf32> to vector<8xf32>
    %30 = vector.shape_cast %29 : vector<8xf32> to vector<8x1xf32>
    %31 = tpu.reciprocal %30 {approx = true} : vector<8x1xf32> -> vector<8x1xf32>
    %32 = vector.broadcast %31 : vector<8x1xf32> to vector<8x8xf32>
    %33 = arith.mulf %28, %32 : vector<8x8xf32>
    %cst_16 = arith.constant dense<0.000000e+00> : vector<8x8xf32>
    %34 = tpu.matmul %33, %15, %cst_16 {dimension_numbers = #tpu.dot_dimension_numbers<[1], [0], [0], [1], [0, 0, 1, 1], [], []>} : vector<8x8xf32>, vector<8x8xf32>, vector<8x8xf32> -> vector<8x8xf32>
    %35 = vector.extract_strided_slice %9 {offsets = [0, 8], sizes = [8, 8], strides = [1, 1]} : vector<8x32xf32> to vector<8x8xf32>
    %36 = vector.extract_strided_slice %10 {offsets = [0, 8], sizes = [8, 8], strides = [1, 1]} : vector<8x32xf32> to vector<8x8xf32>
    %37 = vector.extract_strided_slice %11 {offsets = [0, 8], sizes = [8, 8], strides = [1, 1]} : vector<8x32xf32> to vector<8x8xf32>
    %38 = tpu.transpose %36, [1, 0] : vector<8x8xf32> -> vector<8x8xf32>
    %cst_17 = arith.constant dense<0.000000e+00> : vector<8x8xf32>
    %39 = tpu.matmul %35, %38, %cst_17 {dimension_numbers = #tpu.dot_dimension_numbers<[1], [0], [0], [1], [0, 0, 1, 1], [], []>} : vector<8x8xf32>, vector<8x8xf32>, vector<8x8xf32> -> vector<8x8xf32>
    %cst_18 = arith.constant 0.353553385 : f32
    %40 = vector.broadcast %cst_18 : f32 to vector<8x8xf32>
    %41 = arith.mulf %39, %40 : vector<8x8xf32>
    %c0_i32_19 = arith.constant 0 : i32
    %42 = vector.broadcast %c0_i32_19 : i32 to vector<8x8xi32>
    %43 = arith.cmpi eq, %12, %42 : vector<8x8xi32>
    %cst_20 = arith.constant -1.000000e+09 : f32
    %44 = vector.broadcast %cst_20 : f32 to vector<8x8xf32>
    %45 = arith.select %43, %44, %41 : vector<8x8xi1>, vector<8x8xf32>
    %cst_21 = arith.constant dense<0xFF800000> : vector<8xf32>
    %46 = vector.multi_reduction <maximumf>, %45, %cst_21 [1] : vector<8x8xf32> to vector<8xf32>
    %47 = vector.shape_cast %46 : vector<8xf32> to vector<8x1xf32>
    %48 = vector.broadcast %47 : vector<8x1xf32> to vector<8x8xf32>
    %49 = arith.subf %45, %48 : vector<8x8xf32>
    %50 = math.exp %49 : vector<8x8xf32>
    %cst_22 = arith.constant dense<0.000000e+00> : vector<8xf32>
    %51 = vector.multi_reduction <add>, %50, %cst_22 [1] : vector<8x8xf32> to vector<8xf32>
    %52 = vector.shape_cast %51 : vector<8xf32> to vector<8x1xf32>
    %53 = tpu.reciprocal %52 {approx = true} : vector<8x1xf32> -> vector<8x1xf32>
    %54 = vector.broadcast %53 : vector<8x1xf32> to vector<8x8xf32>
    %55 = arith.mulf %50, %54 : vector<8x8xf32>
    %cst_23 = arith.constant dense<0.000000e+00> : vector<8x8xf32>
    %56 = tpu.matmul %55, %37, %cst_23 {dimension_numbers = #tpu.dot_dimension_numbers<[1], [0], [0], [1], [0, 0, 1, 1], [], []>} : vector<8x8xf32>, vector<8x8xf32>, vector<8x8xf32> -> vector<8x8xf32>
    %57 = vector.extract_strided_slice %9 {offsets = [0, 16], sizes = [8, 8], strides = [1, 1]} : vector<8x32xf32> to vector<8x8xf32>
    %58 = vector.extract_strided_slice %10 {offsets = [0, 16], sizes = [8, 8], strides = [1, 1]} : vector<8x32xf32> to vector<8x8xf32>
    %59 = vector.extract_strided_slice %11 {offsets = [0, 16], sizes = [8, 8], strides = [1, 1]} : vector<8x32xf32> to vector<8x8xf32>
    %60 = tpu.transpose %58, [1, 0] : vector<8x8xf32> -> vector<8x8xf32>
    %cst_24 = arith.constant dense<0.000000e+00> : vector<8x8xf32>
    %61 = tpu.matmul %57, %60, %cst_24 {dimension_numbers = #tpu.dot_dimension_numbers<[1], [0], [0], [1], [0, 0, 1, 1], [], []>} : vector<8x8xf32>, vector<8x8xf32>, vector<8x8xf32> -> vector<8x8xf32>
    %cst_25 = arith.constant 0.353553385 : f32
    %62 = vector.broadcast %cst_25 : f32 to vector<8x8xf32>
    %63 = arith.mulf %61, %62 : vector<8x8xf32>
    %c0_i32_26 = arith.constant 0 : i32
    %64 = vector.broadcast %c0_i32_26 : i32 to vector<8x8xi32>
    %65 = arith.cmpi eq, %12, %64 : vector<8x8xi32>
    %cst_27 = arith.constant -1.000000e+09 : f32
    %66 = vector.broadcast %cst_27 : f32 to vector<8x8xf32>
    %67 = arith.select %65, %66, %63 : vector<8x8xi1>, vector<8x8xf32>
    %cst_28 = arith.constant dense<0xFF800000> : vector<8xf32>
    %68 = vector.multi_reduction <maximumf>, %67, %cst_28 [1] : vector<8x8xf32> to vector<8xf32>
    %69 = vector.shape_cast %68 : vector<8xf32> to vector<8x1xf32>
    %70 = vector.broadcast %69 : vector<8x1xf32> to vector<8x8xf32>
    %71 = arith.subf %67, %70 : vector<8x8xf32>
    %72 = math.exp %71 : vector<8x8xf32>
    %cst_29 = arith.constant dense<0.000000e+00> : vector<8xf32>
    %73 = vector.multi_reduction <add>, %72, %cst_29 [1] : vector<8x8xf32> to vector<8xf32>
    %74 = vector.shape_cast %73 : vector<8xf32> to vector<8x1xf32>
    %75 = tpu.reciprocal %74 {approx = true} : vector<8x1xf32> -> vector<8x1xf32>
    %76 = vector.broadcast %75 : vector<8x1xf32> to vector<8x8xf32>
    %77 = arith.mulf %72, %76 : vector<8x8xf32>
    %cst_30 = arith.constant dense<0.000000e+00> : vector<8x8xf32>
    %78 = tpu.matmul %77, %59, %cst_30 {dimension_numbers = #tpu.dot_dimension_numbers<[1], [0], [0], [1], [0, 0, 1, 1], [], []>} : vector<8x8xf32>, vector<8x8xf32>, vector<8x8xf32> -> vector<8x8xf32>
    %79 = vector.extract_strided_slice %9 {offsets = [0, 24], sizes = [8, 8], strides = [1, 1]} : vector<8x32xf32> to vector<8x8xf32>
    %80 = vector.extract_strided_slice %10 {offsets = [0, 24], sizes = [8, 8], strides = [1, 1]} : vector<8x32xf32> to vector<8x8xf32>
    %81 = vector.extract_strided_slice %11 {offsets = [0, 24], sizes = [8, 8], strides = [1, 1]} : vector<8x32xf32> to vector<8x8xf32>
    %82 = tpu.transpose %80, [1, 0] : vector<8x8xf32> -> vector<8x8xf32>
    %cst_31 = arith.constant dense<0.000000e+00> : vector<8x8xf32>
    %83 = tpu.matmul %79, %82, %cst_31 {dimension_numbers = #tpu.dot_dimension_numbers<[1], [0], [0], [1], [0, 0, 1, 1], [], []>} : vector<8x8xf32>, vector<8x8xf32>, vector<8x8xf32> -> vector<8x8xf32>
    %cst_32 = arith.constant 0.353553385 : f32
    %84 = vector.broadcast %cst_32 : f32 to vector<8x8xf32>
    %85 = arith.mulf %83, %84 : vector<8x8xf32>
    %c0_i32_33 = arith.constant 0 : i32
    %86 = vector.broadcast %c0_i32_33 : i32 to vector<8x8xi32>
    %87 = arith.cmpi eq, %12, %86 : vector<8x8xi32>
    %cst_34 = arith.constant -1.000000e+09 : f32
    %88 = vector.broadcast %cst_34 : f32 to vector<8x8xf32>
    %89 = arith.select %87, %88, %85 : vector<8x8xi1>, vector<8x8xf32>
    %cst_35 = arith.constant dense<0xFF800000> : vector<8xf32>
    %90 = vector.multi_reduction <maximumf>, %89, %cst_35 [1] : vector<8x8xf32> to vector<8xf32>
    %91 = vector.shape_cast %90 : vector<8xf32> to vector<8x1xf32>
    %92 = vector.broadcast %91 : vector<8x1xf32> to vector<8x8xf32>
    %93 = arith.subf %89, %92 : vector<8x8xf32>
    %94 = math.exp %93 : vector<8x8xf32>
    %cst_36 = arith.constant dense<0.000000e+00> : vector<8xf32>
    %95 = vector.multi_reduction <add>, %94, %cst_36 [1] : vector<8x8xf32> to vector<8xf32>
    %96 = vector.shape_cast %95 : vector<8xf32> to vector<8x1xf32>
    %97 = tpu.reciprocal %96 {approx = true} : vector<8x1xf32> -> vector<8x1xf32>
    %98 = vector.broadcast %97 : vector<8x1xf32> to vector<8x8xf32>
    %99 = arith.mulf %94, %98 : vector<8x8xf32>
    %cst_37 = arith.constant dense<0.000000e+00> : vector<8x8xf32>
    %100 = tpu.matmul %99, %81, %cst_37 {dimension_numbers = #tpu.dot_dimension_numbers<[1], [0], [0], [1], [0, 0, 1, 1], [], []>} : vector<8x8xf32>, vector<8x8xf32>, vector<8x8xf32> -> vector<8x8xf32>
    %101 = tpu.concatenate %34, %56, %78, %100 in 1 : vector<8x8xf32>, vector<8x8xf32>, vector<8x8xf32>, vector<8x8xf32> -> vector<8x32xf32>
    %c0_38 = arith.constant 0 : index
    %c0_39 = arith.constant 0 : index
    %102 = vector.load %arg7[%c0_38, %c0_39] : memref<32x32xf32, #tpu.memory_space<vmem>>, vector<32x32xf32>
    %cst_40 = arith.constant dense<0.000000e+00> : vector<8x32xf32>
    %103 = tpu.matmul %101, %102, %cst_40 {dimension_numbers = #tpu.dot_dimension_numbers<[1], [0], [0], [1], [0, 0, 1, 1], [], []>} : vector<8x32xf32>, vector<32x32xf32>, vector<8x32xf32> -> vector<8x32xf32>
    %c0_41 = arith.constant 0 : index
    %c0_42 = arith.constant 0 : index
    %104 = vector.load %arg8[%c0_41, %c0_42] : memref<1x32xf32, #tpu.memory_space<vmem>>, vector<1x32xf32>
    %105 = vector.broadcast %104 : vector<1x32xf32> to vector<8x32xf32>
    %106 = arith.addf %103, %105 : vector<8x32xf32>
    %c0_43 = arith.constant 0 : index
    %c0_44 = arith.constant 0 : index
    %107 = vector.load %arg15[%c0_43, %c0_44] : memref<1x32xf32, #tpu.memory_space<vmem>>, vector<1x32xf32>
    %c0_45 = arith.constant 0 : index
    %c0_46 = arith.constant 0 : index
    %108 = vector.load %arg16[%c0_45, %c0_46] : memref<1x32xf32, #tpu.memory_space<vmem>>, vector<1x32xf32>
    %109 = arith.addf %1, %106 : vector<8x32xf32>
    %cst_47 = arith.constant dense<0.000000e+00> : vector<8xf32>
    %110 = vector.multi_reduction <add>, %109, %cst_47 [1] : vector<8x32xf32> to vector<8xf32>
    %111 = vector.shape_cast %110 : vector<8xf32> to vector<8x1xf32>
    %cst_48 = arith.constant 3.200000e+01 : f32
    %112 = vector.broadcast %cst_48 : f32 to vector<8x1xf32>
    %113 = arith.divf %111, %112 : vector<8x1xf32>
    %114 = vector.broadcast %113 : vector<8x1xf32> to vector<8x32xf32>
    %115 = arith.subf %109, %114 : vector<8x32xf32>
    %116 = vector.broadcast %113 : vector<8x1xf32> to vector<8x32xf32>
    %117 = arith.subf %109, %116 : vector<8x32xf32>
    %118 = arith.mulf %115, %117 : vector<8x32xf32>
    %cst_49 = arith.constant dense<0.000000e+00> : vector<8xf32>
    %119 = vector.multi_reduction <add>, %118, %cst_49 [1] : vector<8x32xf32> to vector<8xf32>
    %120 = vector.shape_cast %119 : vector<8xf32> to vector<8x1xf32>
    %cst_50 = arith.constant 3.200000e+01 : f32
    %121 = vector.broadcast %cst_50 : f32 to vector<8x1xf32>
    %122 = arith.divf %120, %121 : vector<8x1xf32>
    %123 = vector.broadcast %113 : vector<8x1xf32> to vector<8x32xf32>
    %124 = arith.subf %109, %123 : vector<8x32xf32>
    %cst_51 = arith.constant 9.99999974E-6 : f32
    %125 = vector.broadcast %cst_51 : f32 to vector<8x1xf32>
    %126 = arith.addf %122, %125 : vector<8x1xf32>
    %127 = math.rsqrt %126 : vector<8x1xf32>
    %128 = vector.broadcast %127 : vector<8x1xf32> to vector<8x32xf32>
    %129 = arith.mulf %124, %128 : vector<8x32xf32>
    %130 = vector.broadcast %107 : vector<1x32xf32> to vector<8x32xf32>
    %131 = arith.mulf %129, %130 : vector<8x32xf32>
    %132 = vector.broadcast %108 : vector<1x32xf32> to vector<8x32xf32>
    %133 = arith.addf %131, %132 : vector<8x32xf32>
    %c0_52 = arith.constant 0 : index
    %c0_53 = arith.constant 0 : index
    %134 = vector.load %arg9[%c0_52, %c0_53] : memref<32x32xf32, #tpu.memory_space<vmem>>, vector<32x32xf32>
    %cst_54 = arith.constant dense<0.000000e+00> : vector<8x32xf32>
    %135 = tpu.matmul %133, %134, %cst_54 {dimension_numbers = #tpu.dot_dimension_numbers<[1], [0], [0], [1], [0, 0, 1, 1], [], []>} : vector<8x32xf32>, vector<32x32xf32>, vector<8x32xf32> -> vector<8x32xf32>
    %c0_55 = arith.constant 0 : index
    %c0_56 = arith.constant 0 : index
    %136 = vector.load %arg10[%c0_55, %c0_56] : memref<1x32xf32, #tpu.memory_space<vmem>>, vector<1x32xf32>
    %137 = vector.broadcast %136 : vector<1x32xf32> to vector<8x32xf32>
    %138 = arith.addf %135, %137 : vector<8x32xf32>
    %c0_57 = arith.constant 0 : index
    %c0_58 = arith.constant 0 : index
    %139 = vector.load %arg11[%c0_57, %c0_58] : memref<32x64xf32, #tpu.memory_space<vmem>>, vector<32x64xf32>
    %cst_59 = arith.constant dense<0.000000e+00> : vector<8x64xf32>
    %140 = tpu.matmul %3, %139, %cst_59 {dimension_numbers = #tpu.dot_dimension_numbers<[1], [0], [0], [1], [0, 0, 1, 1], [], []>} : vector<8x32xf32>, vector<32x64xf32>, vector<8x64xf32> -> vector<8x64xf32>
    %c0_60 = arith.constant 0 : index
    %c0_61 = arith.constant 0 : index
    %141 = vector.load %arg12[%c0_60, %c0_61] : memref<1x64xf32, #tpu.memory_space<vmem>>, vector<1x64xf32>
    %142 = vector.broadcast %141 : vector<1x64xf32> to vector<8x64xf32>
    %143 = arith.addf %140, %142 : vector<8x64xf32>
    %144 = vector.extract_strided_slice %143 {offsets = [0, 0], sizes = [8, 32], strides = [1, 1]} : vector<8x64xf32> to vector<8x32xf32>
    %145 = vector.extract_strided_slice %143 {offsets = [0, 32], sizes = [8, 32], strides = [1, 1]} : vector<8x64xf32> to vector<8x32xf32>
    %c0_62 = arith.constant 0 : index
    %c0_63 = arith.constant 0 : index
    %146 = vector.load %arg4[%c0_62, %c0_63] : memref<8x8xi32, #tpu.memory_space<vmem>>, vector<8x8xi32>
    %147 = vector.extract_strided_slice %138 {offsets = [0, 0], sizes = [8, 8], strides = [1, 1]} : vector<8x32xf32> to vector<8x8xf32>
    %148 = vector.extract_strided_slice %144 {offsets = [0, 0], sizes = [8, 8], strides = [1, 1]} : vector<8x32xf32> to vector<8x8xf32>
    %149 = vector.extract_strided_slice %145 {offsets = [0, 0], sizes = [8, 8], strides = [1, 1]} : vector<8x32xf32> to vector<8x8xf32>
    %150 = tpu.transpose %148, [1, 0] : vector<8x8xf32> -> vector<8x8xf32>
    %cst_64 = arith.constant dense<0.000000e+00> : vector<8x8xf32>
    %151 = tpu.matmul %147, %150, %cst_64 {dimension_numbers = #tpu.dot_dimension_numbers<[1], [0], [0], [1], [0, 0, 1, 1], [], []>} : vector<8x8xf32>, vector<8x8xf32>, vector<8x8xf32> -> vector<8x8xf32>
    %cst_65 = arith.constant 0.353553385 : f32
    %152 = vector.broadcast %cst_65 : f32 to vector<8x8xf32>
    %153 = arith.mulf %151, %152 : vector<8x8xf32>
    %c0_i32_66 = arith.constant 0 : i32
    %154 = vector.broadcast %c0_i32_66 : i32 to vector<8x8xi32>
    %155 = arith.cmpi eq, %146, %154 : vector<8x8xi32>
    %cst_67 = arith.constant -1.000000e+09 : f32
    %156 = vector.broadcast %cst_67 : f32 to vector<8x8xf32>
    %157 = arith.select %155, %156, %153 : vector<8x8xi1>, vector<8x8xf32>
    %cst_68 = arith.constant dense<0xFF800000> : vector<8xf32>
    %158 = vector.multi_reduction <maximumf>, %157, %cst_68 [1] : vector<8x8xf32> to vector<8xf32>
    %159 = vector.shape_cast %158 : vector<8xf32> to vector<8x1xf32>
    %160 = vector.broadcast %159 : vector<8x1xf32> to vector<8x8xf32>
    %161 = arith.subf %157, %160 : vector<8x8xf32>
    %162 = math.exp %161 : vector<8x8xf32>
    %cst_69 = arith.constant dense<0.000000e+00> : vector<8xf32>
    %163 = vector.multi_reduction <add>, %162, %cst_69 [1] : vector<8x8xf32> to vector<8xf32>
    %164 = vector.shape_cast %163 : vector<8xf32> to vector<8x1xf32>
    %165 = tpu.reciprocal %164 {approx = true} : vector<8x1xf32> -> vector<8x1xf32>
    %166 = vector.broadcast %165 : vector<8x1xf32> to vector<8x8xf32>
    %167 = arith.mulf %162, %166 : vector<8x8xf32>
    %cst_70 = arith.constant dense<0.000000e+00> : vector<8x8xf32>
    %168 = tpu.matmul %167, %149, %cst_70 {dimension_numbers = #tpu.dot_dimension_numbers<[1], [0], [0], [1], [0, 0, 1, 1], [], []>} : vector<8x8xf32>, vector<8x8xf32>, vector<8x8xf32> -> vector<8x8xf32>
    %169 = vector.extract_strided_slice %138 {offsets = [0, 8], sizes = [8, 8], strides = [1, 1]} : vector<8x32xf32> to vector<8x8xf32>
    %170 = vector.extract_strided_slice %144 {offsets = [0, 8], sizes = [8, 8], strides = [1, 1]} : vector<8x32xf32> to vector<8x8xf32>
    %171 = vector.extract_strided_slice %145 {offsets = [0, 8], sizes = [8, 8], strides = [1, 1]} : vector<8x32xf32> to vector<8x8xf32>
    %172 = tpu.transpose %170, [1, 0] : vector<8x8xf32> -> vector<8x8xf32>
    %cst_71 = arith.constant dense<0.000000e+00> : vector<8x8xf32>
    %173 = tpu.matmul %169, %172, %cst_71 {dimension_numbers = #tpu.dot_dimension_numbers<[1], [0], [0], [1], [0, 0, 1, 1], [], []>} : vector<8x8xf32>, vector<8x8xf32>, vector<8x8xf32> -> vector<8x8xf32>
    %cst_72 = arith.constant 0.353553385 : f32
    %174 = vector.broadcast %cst_72 : f32 to vector<8x8xf32>
    %175 = arith.mulf %173, %174 : vector<8x8xf32>
    %c0_i32_73 = arith.constant 0 : i32
    %176 = vector.broadcast %c0_i32_73 : i32 to vector<8x8xi32>
    %177 = arith.cmpi eq, %146, %176 : vector<8x8xi32>
    %cst_74 = arith.constant -1.000000e+09 : f32
    %178 = vector.broadcast %cst_74 : f32 to vector<8x8xf32>
    %179 = arith.select %177, %178, %175 : vector<8x8xi1>, vector<8x8xf32>
    %cst_75 = arith.constant dense<0xFF800000> : vector<8xf32>
    %180 = vector.multi_reduction <maximumf>, %179, %cst_75 [1] : vector<8x8xf32> to vector<8xf32>
    %181 = vector.shape_cast %180 : vector<8xf32> to vector<8x1xf32>
    %182 = vector.broadcast %181 : vector<8x1xf32> to vector<8x8xf32>
    %183 = arith.subf %179, %182 : vector<8x8xf32>
    %184 = math.exp %183 : vector<8x8xf32>
    %cst_76 = arith.constant dense<0.000000e+00> : vector<8xf32>
    %185 = vector.multi_reduction <add>, %184, %cst_76 [1] : vector<8x8xf32> to vector<8xf32>
    %186 = vector.shape_cast %185 : vector<8xf32> to vector<8x1xf32>
    %187 = tpu.reciprocal %186 {approx = true} : vector<8x1xf32> -> vector<8x1xf32>
    %188 = vector.broadcast %187 : vector<8x1xf32> to vector<8x8xf32>
    %189 = arith.mulf %184, %188 : vector<8x8xf32>
    %cst_77 = arith.constant dense<0.000000e+00> : vector<8x8xf32>
    %190 = tpu.matmul %189, %171, %cst_77 {dimension_numbers = #tpu.dot_dimension_numbers<[1], [0], [0], [1], [0, 0, 1, 1], [], []>} : vector<8x8xf32>, vector<8x8xf32>, vector<8x8xf32> -> vector<8x8xf32>
    %191 = vector.extract_strided_slice %138 {offsets = [0, 16], sizes = [8, 8], strides = [1, 1]} : vector<8x32xf32> to vector<8x8xf32>
    %192 = vector.extract_strided_slice %144 {offsets = [0, 16], sizes = [8, 8], strides = [1, 1]} : vector<8x32xf32> to vector<8x8xf32>
    %193 = vector.extract_strided_slice %145 {offsets = [0, 16], sizes = [8, 8], strides = [1, 1]} : vector<8x32xf32> to vector<8x8xf32>
    %194 = tpu.transpose %192, [1, 0] : vector<8x8xf32> -> vector<8x8xf32>
    %cst_78 = arith.constant dense<0.000000e+00> : vector<8x8xf32>
    %195 = tpu.matmul %191, %194, %cst_78 {dimension_numbers = #tpu.dot_dimension_numbers<[1], [0], [0], [1], [0, 0, 1, 1], [], []>} : vector<8x8xf32>, vector<8x8xf32>, vector<8x8xf32> -> vector<8x8xf32>
    %cst_79 = arith.constant 0.353553385 : f32
    %196 = vector.broadcast %cst_79 : f32 to vector<8x8xf32>
    %197 = arith.mulf %195, %196 : vector<8x8xf32>
    %c0_i32_80 = arith.constant 0 : i32
    %198 = vector.broadcast %c0_i32_80 : i32 to vector<8x8xi32>
    %199 = arith.cmpi eq, %146, %198 : vector<8x8xi32>
    %cst_81 = arith.constant -1.000000e+09 : f32
    %200 = vector.broadcast %cst_81 : f32 to vector<8x8xf32>
    %201 = arith.select %199, %200, %197 : vector<8x8xi1>, vector<8x8xf32>
    %cst_82 = arith.constant dense<0xFF800000> : vector<8xf32>
    %202 = vector.multi_reduction <maximumf>, %201, %cst_82 [1] : vector<8x8xf32> to vector<8xf32>
    %203 = vector.shape_cast %202 : vector<8xf32> to vector<8x1xf32>
    %204 = vector.broadcast %203 : vector<8x1xf32> to vector<8x8xf32>
    %205 = arith.subf %201, %204 : vector<8x8xf32>
    %206 = math.exp %205 : vector<8x8xf32>
    %cst_83 = arith.constant dense<0.000000e+00> : vector<8xf32>
    %207 = vector.multi_reduction <add>, %206, %cst_83 [1] : vector<8x8xf32> to vector<8xf32>
    %208 = vector.shape_cast %207 : vector<8xf32> to vector<8x1xf32>
    %209 = tpu.reciprocal %208 {approx = true} : vector<8x1xf32> -> vector<8x1xf32>
    %210 = vector.broadcast %209 : vector<8x1xf32> to vector<8x8xf32>
    %211 = arith.mulf %206, %210 : vector<8x8xf32>
    %cst_84 = arith.constant dense<0.000000e+00> : vector<8x8xf32>
    %212 = tpu.matmul %211, %193, %cst_84 {dimension_numbers = #tpu.dot_dimension_numbers<[1], [0], [0], [1], [0, 0, 1, 1], [], []>} : vector<8x8xf32>, vector<8x8xf32>, vector<8x8xf32> -> vector<8x8xf32>
    %213 = vector.extract_strided_slice %138 {offsets = [0, 24], sizes = [8, 8], strides = [1, 1]} : vector<8x32xf32> to vector<8x8xf32>
    %214 = vector.extract_strided_slice %144 {offsets = [0, 24], sizes = [8, 8], strides = [1, 1]} : vector<8x32xf32> to vector<8x8xf32>
    %215 = vector.extract_strided_slice %145 {offsets = [0, 24], sizes = [8, 8], strides = [1, 1]} : vector<8x32xf32> to vector<8x8xf32>
    %216 = tpu.transpose %214, [1, 0] : vector<8x8xf32> -> vector<8x8xf32>
    %cst_85 = arith.constant dense<0.000000e+00> : vector<8x8xf32>
    %217 = tpu.matmul %213, %216, %cst_85 {dimension_numbers = #tpu.dot_dimension_numbers<[1], [0], [0], [1], [0, 0, 1, 1], [], []>} : vector<8x8xf32>, vector<8x8xf32>, vector<8x8xf32> -> vector<8x8xf32>
    %cst_86 = arith.constant 0.353553385 : f32
    %218 = vector.broadcast %cst_86 : f32 to vector<8x8xf32>
    %219 = arith.mulf %217, %218 : vector<8x8xf32>
    %c0_i32_87 = arith.constant 0 : i32
    %220 = vector.broadcast %c0_i32_87 : i32 to vector<8x8xi32>
    %221 = arith.cmpi eq, %146, %220 : vector<8x8xi32>
    %cst_88 = arith.constant -1.000000e+09 : f32
    %222 = vector.broadcast %cst_88 : f32 to vector<8x8xf32>
    %223 = arith.select %221, %222, %219 : vector<8x8xi1>, vector<8x8xf32>
    %cst_89 = arith.constant dense<0xFF800000> : vector<8xf32>
    %224 = vector.multi_reduction <maximumf>, %223, %cst_89 [1] : vector<8x8xf32> to vector<8xf32>
    %225 = vector.shape_cast %224 : vector<8xf32> to vector<8x1xf32>
    %226 = vector.broadcast %225 : vector<8x1xf32> to vector<8x8xf32>
    %227 = arith.subf %223, %226 : vector<8x8xf32>
    %228 = math.exp %227 : vector<8x8xf32>
    %cst_90 = arith.constant dense<0.000000e+00> : vector<8xf32>
    %229 = vector.multi_reduction <add>, %228, %cst_90 [1] : vector<8x8xf32> to vector<8xf32>
    %230 = vector.shape_cast %229 : vector<8xf32> to vector<8x1xf32>
    %231 = tpu.reciprocal %230 {approx = true} : vector<8x1xf32> -> vector<8x1xf32>
    %232 = vector.broadcast %231 : vector<8x1xf32> to vector<8x8xf32>
    %233 = arith.mulf %228, %232 : vector<8x8xf32>
    %cst_91 = arith.constant dense<0.000000e+00> : vector<8x8xf32>
    %234 = tpu.matmul %233, %215, %cst_91 {dimension_numbers = #tpu.dot_dimension_numbers<[1], [0], [0], [1], [0, 0, 1, 1], [], []>} : vector<8x8xf32>, vector<8x8xf32>, vector<8x8xf32> -> vector<8x8xf32>
    %235 = tpu.concatenate %168, %190, %212, %234 in 1 : vector<8x8xf32>, vector<8x8xf32>, vector<8x8xf32>, vector<8x8xf32> -> vector<8x32xf32>
    %c0_92 = arith.constant 0 : index
    %c0_93 = arith.constant 0 : index
    %236 = vector.load %arg13[%c0_92, %c0_93] : memref<32x32xf32, #tpu.memory_space<vmem>>, vector<32x32xf32>
    %cst_94 = arith.constant dense<0.000000e+00> : vector<8x32xf32>
    %237 = tpu.matmul %235, %236, %cst_94 {dimension_numbers = #tpu.dot_dimension_numbers<[1], [0], [0], [1], [0, 0, 1, 1], [], []>} : vector<8x32xf32>, vector<32x32xf32>, vector<8x32xf32> -> vector<8x32xf32>
    %c0_95 = arith.constant 0 : index
    %c0_96 = arith.constant 0 : index
    %238 = vector.load %arg14[%c0_95, %c0_96] : memref<1x32xf32, #tpu.memory_space<vmem>>, vector<1x32xf32>
    %239 = vector.broadcast %238 : vector<1x32xf32> to vector<8x32xf32>
    %240 = arith.addf %237, %239 : vector<8x32xf32>
    %c0_97 = arith.constant 0 : index
    %c0_98 = arith.constant 0 : index
    %241 = vector.load %arg17[%c0_97, %c0_98] : memref<1x32xf32, #tpu.memory_space<vmem>>, vector<1x32xf32>
    %c0_99 = arith.constant 0 : index
    %c0_100 = arith.constant 0 : index
    %242 = vector.load %arg18[%c0_99, %c0_100] : memref<1x32xf32, #tpu.memory_space<vmem>>, vector<1x32xf32>
    %243 = arith.addf %133, %240 : vector<8x32xf32>
    %cst_101 = arith.constant dense<0.000000e+00> : vector<8xf32>
    %244 = vector.multi_reduction <add>, %243, %cst_101 [1] : vector<8x32xf32> to vector<8xf32>
    %245 = vector.shape_cast %244 : vector<8xf32> to vector<8x1xf32>
    %cst_102 = arith.constant 3.200000e+01 : f32
    %246 = vector.broadcast %cst_102 : f32 to vector<8x1xf32>
    %247 = arith.divf %245, %246 : vector<8x1xf32>
    %248 = vector.broadcast %247 : vector<8x1xf32> to vector<8x32xf32>
    %249 = arith.subf %243, %248 : vector<8x32xf32>
    %250 = vector.broadcast %247 : vector<8x1xf32> to vector<8x32xf32>
    %251 = arith.subf %243, %250 : vector<8x32xf32>
    %252 = arith.mulf %249, %251 : vector<8x32xf32>
    %cst_103 = arith.constant dense<0.000000e+00> : vector<8xf32>
    %253 = vector.multi_reduction <add>, %252, %cst_103 [1] : vector<8x32xf32> to vector<8xf32>
    %254 = vector.shape_cast %253 : vector<8xf32> to vector<8x1xf32>
    %cst_104 = arith.constant 3.200000e+01 : f32
    %255 = vector.broadcast %cst_104 : f32 to vector<8x1xf32>
    %256 = arith.divf %254, %255 : vector<8x1xf32>
    %257 = vector.broadcast %247 : vector<8x1xf32> to vector<8x32xf32>
    %258 = arith.subf %243, %257 : vector<8x32xf32>
    %cst_105 = arith.constant 9.99999974E-6 : f32
    %259 = vector.broadcast %cst_105 : f32 to vector<8x1xf32>
    %260 = arith.addf %256, %259 : vector<8x1xf32>
    %261 = math.rsqrt %260 : vector<8x1xf32>
    %262 = vector.broadcast %261 : vector<8x1xf32> to vector<8x32xf32>
    %263 = arith.mulf %258, %262 : vector<8x32xf32>
    %264 = vector.broadcast %241 : vector<1x32xf32> to vector<8x32xf32>
    %265 = arith.mulf %263, %264 : vector<8x32xf32>
    %266 = vector.broadcast %242 : vector<1x32xf32> to vector<8x32xf32>
    %267 = arith.addf %265, %266 : vector<8x32xf32>
    %c0_106 = arith.constant 0 : index
    %c0_107 = arith.constant 0 : index
    %268 = vector.load %arg19[%c0_106, %c0_107] : memref<32x64xf32, #tpu.memory_space<vmem>>, vector<32x64xf32>
    %cst_108 = arith.constant dense<0.000000e+00> : vector<8x64xf32>
    %269 = tpu.matmul %267, %268, %cst_108 {dimension_numbers = #tpu.dot_dimension_numbers<[1], [0], [0], [1], [0, 0, 1, 1], [], []>} : vector<8x32xf32>, vector<32x64xf32>, vector<8x64xf32> -> vector<8x64xf32>
    %c0_109 = arith.constant 0 : index
    %c0_110 = arith.constant 0 : index
    %270 = vector.load %arg20[%c0_109, %c0_110] : memref<1x64xf32, #tpu.memory_space<vmem>>, vector<1x64xf32>
    %271 = vector.broadcast %270 : vector<1x64xf32> to vector<8x64xf32>
    %272 = arith.addf %269, %271 : vector<8x64xf32>
    %cst_111 = arith.constant 0.000000e+00 : f32
    %273 = vector.broadcast %cst_111 : f32 to vector<8x64xf32>
    %274 = arith.maximumf %272, %273 : vector<8x64xf32>
    %c0_112 = arith.constant 0 : index
    %c0_113 = arith.constant 0 : index
    %275 = vector.load %arg21[%c0_112, %c0_113] : memref<64x32xf32, #tpu.memory_space<vmem>>, vector<64x32xf32>
    %cst_114 = arith.constant dense<0.000000e+00> : vector<8x32xf32>
    %276 = tpu.matmul %274, %275, %cst_114 {dimension_numbers = #tpu.dot_dimension_numbers<[1], [0], [0], [1], [0, 0, 1, 1], [], []>} : vector<8x64xf32>, vector<64x32xf32>, vector<8x32xf32> -> vector<8x32xf32>
    %c0_115 = arith.constant 0 : index
    %c0_116 = arith.constant 0 : index
    %277 = vector.load %arg22[%c0_115, %c0_116] : memref<1x32xf32, #tpu.memory_space<vmem>>, vector<1x32xf32>
    %278 = vector.broadcast %277 : vector<1x32xf32> to vector<8x32xf32>
    %279 = arith.addf %276, %278 : vector<8x32xf32>
    %c0_117 = arith.constant 0 : index
    %c0_118 = arith.constant 0 : index
    %280 = vector.load %arg23[%c0_117, %c0_118] : memref<1x32xf32, #tpu.memory_space<vmem>>, vector<1x32xf32>
    %c0_119 = arith.constant 0 : index
    %c0_120 = arith.constant 0 : index
    %281 = vector.load %arg24[%c0_119, %c0_120] : memref<1x32xf32, #tpu.memory_space<vmem>>, vector<1x32xf32>
    %282 = arith.addf %267, %279 : vector<8x32xf32>
    %cst_121 = arith.constant dense<0.000000e+00> : vector<8xf32>
    %283 = vector.multi_reduction <add>, %282, %cst_121 [1] : vector<8x32xf32> to vector<8xf32>
    %284 = vector.shape_cast %283 : vector<8xf32> to vector<8x1xf32>
    %cst_122 = arith.constant 3.200000e+01 : f32
    %285 = vector.broadcast %cst_122 : f32 to vector<8x1xf32>
    %286 = arith.divf %284, %285 : vector<8x1xf32>
    %287 = vector.broadcast %286 : vector<8x1xf32> to vector<8x32xf32>
    %288 = arith.subf %282, %287 : vector<8x32xf32>
    %289 = vector.broadcast %286 : vector<8x1xf32> to vector<8x32xf32>
    %290 = arith.subf %282, %289 : vector<8x32xf32>
    %291 = arith.mulf %288, %290 : vector<8x32xf32>
    %cst_123 = arith.constant dense<0.000000e+00> : vector<8xf32>
    %292 = vector.multi_reduction <add>, %291, %cst_123 [1] : vector<8x32xf32> to vector<8xf32>
    %293 = vector.shape_cast %292 : vector<8xf32> to vector<8x1xf32>
    %cst_124 = arith.constant 3.200000e+01 : f32
    %294 = vector.broadcast %cst_124 : f32 to vector<8x1xf32>
    %295 = arith.divf %293, %294 : vector<8x1xf32>
    %296 = vector.broadcast %286 : vector<8x1xf32> to vector<8x32xf32>
    %297 = arith.subf %282, %296 : vector<8x32xf32>
    %cst_125 = arith.constant 9.99999974E-6 : f32
    %298 = vector.broadcast %cst_125 : f32 to vector<8x1xf32>
    %299 = arith.addf %295, %298 : vector<8x1xf32>
    %300 = math.rsqrt %299 : vector<8x1xf32>
    %301 = vector.broadcast %300 : vector<8x1xf32> to vector<8x32xf32>
    %302 = arith.mulf %297, %301 : vector<8x32xf32>
    %303 = vector.broadcast %280 : vector<1x32xf32> to vector<8x32xf32>
    %304 = arith.mulf %302, %303 : vector<8x32xf32>
    %305 = vector.broadcast %281 : vector<1x32xf32> to vector<8x32xf32>
    %306 = arith.addf %304, %305 : vector<8x32xf32>
    %c0_126 = arith.constant 0 : index
    %c0_127 = arith.constant 0 : index
    %c0_128 = arith.constant 0 : index
    %307 = vector.load %arg25[%c0_126, %c0_127, %c0_128] : memref<1x8x32xf32, #tpu.memory_space<vmem>>, vector<1x8x32xf32>
    %308 = vector.shape_cast %307 : vector<1x8x32xf32> to vector<8x32xf32>
    %309 = vector.shape_cast %306 : vector<8x32xf32> to vector<1x8x32xf32>
    tpu.vector_store %arg25[%c0_126, %c0_127, %c0_128], %309 {strides = array<i32>} : memref<1x8x32xf32, #tpu.memory_space<vmem>>, vector<1x8x32xf32>,
    return
  }
  func.func @transform_0(%arg0: i32) -> (i32, i32, i32) {
    %c0_i32 = arith.constant 0 : i32
    %c0_i32_0 = arith.constant 0 : i32
    %c0_i32_1 = arith.constant 0 : i32
    return %arg0, %c0_i32, %c0_i32_0 : i32, i32, i32
  }
  func.func @transform_1(%arg0: i32) -> (i32, i32, i32) {
    %c0_i32 = arith.constant 0 : i32
    %c0_i32_0 = arith.constant 0 : i32
    %c0_i32_1 = arith.constant 0 : i32
    return %arg0, %c0_i32, %c0_i32_0 : i32, i32, i32
  }
  func.func @transform_2(%arg0: i32) -> (i32, i32) {
    %c0_i32 = arith.constant 0 : i32
    %c0_i32_0 = arith.constant 0 : i32
    %c0_i32_1 = arith.constant 0 : i32
    return %c0_i32, %c0_i32_0 : i32, i32
  }
  func.func @transform_3(%arg0: i32) -> (i32, i32) {
    %c0_i32 = arith.constant 0 : i32
    %c0_i32_0 = arith.constant 0 : i32
    %c0_i32_1 = arith.constant 0 : i32
    return %c0_i32, %c0_i32_0 : i32, i32
  }
  func.func @transform_4(%arg0: i32) -> (i32, i32) {
    %c0_i32 = arith.constant 0 : i32
    %c0_i32_0 = arith.constant 0 : i32
    %c0_i32_1 = arith.constant 0 : i32
    return %c0_i32, %c0_i32_0 : i32, i32
  }
  func.func @transform_5(%arg0: i32) -> (i32, i32) {
    %c0_i32 = arith.constant 0 : i32
    %c0_i32_0 = arith.constant 0 : i32
    %c0_i32_1 = arith.constant 0 : i32
    return %c0_i32, %c0_i32_0 : i32, i32
  }
  func.func @transform_6(%arg0: i32) -> (i32, i32) {
    %c0_i32 = arith.constant 0 : i32
    %c0_i32_0 = arith.constant 0 : i32
    %c0_i32_1 = arith.constant 0 : i32
    return %c0_i32, %c0_i32_0 : i32, i32
  }
  func.func @transform_7(%arg0: i32) -> (i32, i32) {
    %c0_i32 = arith.constant 0 : i32
    %c0_i32_0 = arith.constant 0 : i32
    %c0_i32_1 = arith.constant 0 : i32
    return %c0_i32, %c0_i32_0 : i32, i32
  }
  func.func @transform_8(%arg0: i32) -> (i32, i32) {
    %c0_i32 = arith.constant 0 : i32
    %c0_i32_0 = arith.constant 0 : i32
    %c0_i32_1 = arith.constant 0 : i32
    return %c0_i32, %c0_i32_0 : i32, i32
  }
  func.func @transform_9(%arg0: i32) -> (i32, i32) {
    %c0_i32 = arith.constant 0 : i32
    %c0_i32_0 = arith.constant 0 : i32
    %c0_i32_1 = arith.constant 0 : i32
    return %c0_i32, %c0_i32_0 : i32, i32
  }
  func.func @transform_10(%arg0: i32) -> (i32, i32) {
    %c0_i32 = arith.constant 0 : i32
    %c0_i32_0 = arith.constant 0 : i32
    %c0_i32_1 = arith.constant 0 : i32
    return %c0_i32, %c0_i32_0 : i32, i32
  }
  func.func @transform_11(%arg0: i32) -> (i32, i32) {
    %c0_i32 = arith.constant 0 : i32
    %c0_i32_0 = arith.constant 0 : i32
    %c0_i32_1 = arith.constant 0 : i32
    return %c0_i32, %c0_i32_0 : i32, i32
  }
  func.func @transform_12(%arg0: i32) -> (i32, i32) {
    %c0_i32 = arith.constant 0 : i32
    %c0_i32_0 = arith.constant 0 : i32
    %c0_i32_1 = arith.constant 0 : i32
    return %c0_i32, %c0_i32_0 : i32, i32
  }
  func.func @transform_13(%arg0: i32) -> (i32, i32) {
    %c0_i32 = arith.constant 0 : i32
    %c0_i32_0 = arith.constant 0 : i32
    %c0_i32_1 = arith.constant 0 : i32
    return %c0_i32, %c0_i32_0 : i32, i32
  }
  func.func @transform_14(%arg0: i32) -> (i32, i32) {
    %c0_i32 = arith.constant 0 : i32
    %c0_i32_0 = arith.constant 0 : i32
    %c0_i32_1 = arith.constant 0 : i32
    return %c0_i32, %c0_i32_0 : i32, i32
  }
  func.func @transform_15(%arg0: i32) -> (i32, i32) {
    %c0_i32 = arith.constant 0 : i32
    %c0_i32_0 = arith.constant 0 : i32
    %c0_i32_1 = arith.constant 0 : i32
    return %c0_i32, %c0_i32_0 : i32, i32
  }
  func.func @transform_16(%arg0: i32) -> (i32, i32) {
    %c0_i32 = arith.constant 0 : i32
    %c0_i32_0 = arith.constant 0 : i32
    %c0_i32_1 = arith.constant 0 : i32
    return %c0_i32, %c0_i32_0 : i32, i32
  }
  func.func @transform_17(%arg0: i32) -> (i32, i32) {
    %c0_i32 = arith.constant 0 : i32
    %c0_i32_0 = arith.constant 0 : i32
    %c0_i32_1 = arith.constant 0 : i32
    return %c0_i32, %c0_i32_0 : i32, i32
  }
  func.func @transform_18(%arg0: i32) -> (i32, i32) {
    %c0_i32 = arith.constant 0 : i32
    %c0_i32_0 = arith.constant 0 : i32
    %c0_i32_1 = arith.constant 0 : i32
    return %c0_i32, %c0_i32_0 : i32, i32
  }
  func.func @transform_19(%arg0: i32) -> (i32, i32) {
    %c0_i32 = arith.constant 0 : i32
    %c0_i32_0 = arith.constant 0 : i32
    %c0_i32_1 = arith.constant 0 : i32
    return %c0_i32, %c0_i32_0 : i32, i32
  }
  func.func @transform_20(%arg0: i32) -> (i32, i32) {
    %c0_i32 = arith.constant 0 : i32
    %c0_i32_0 = arith.constant 0 : i32
    %c0_i32_1 = arith.constant 0 : i32
    return %c0_i32, %c0_i32_0 : i32, i32
  }
  func.func @transform_21(%arg0: i32) -> (i32, i32) {
    %c0_i32 = arith.constant 0 : i32
    %c0_i32_0 = arith.constant 0 : i32
    %c0_i32_1 = arith.constant 0 : i32
    return %c0_i32, %c0_i32_0 : i32, i32
  }
  func.func @transform_22(%arg0: i32) -> (i32, i32) {
    %c0_i32 = arith.constant 0 : i32
    %c0_i32_0 = arith.constant 0 : i32
    %c0_i32_1 = arith.constant 0 : i32
    return %c0_i32, %c0_i32_0 : i32, i32
  }
  func.func @transform_23(%arg0: i32) -> (i32, i32) {
    %c0_i32 = arith.constant 0 : i32
    %c0_i32_0 = arith.constant 0 : i32
    %c0_i32_1 = arith.constant 0 : i32
    return %c0_i32, %c0_i32_0 : i32, i32
  }
  func.func @transform_24(%arg0: i32) -> (i32, i32, i32) {
    %c0_i32 = arith.constant 0 : i32
    %c0_i32_0 = arith.constant 0 : i32
    %c0_i32_1 = arith.constant 0 : i32
    return %arg0, %c0_i32, %c0_i32_0 : i32, i32, i32
  }
}

</mosaic_0001>

<bundles_post_ra>
// kernel: tpu_custom_call.1
= control target key start
LH: loop header
LB: loop body
LE: loop exit
PB: predicated region body
PF: predicated region fallthrough
CT: control target
= control target key end

     0   :  { %s4940_s0 = inlined_call_operand.hbm [shape: f32[2,8,32], index: 0, kind: input, shape index: {}]   ;;  %s4941_s1 = inlined_call_operand.hbm [shape: f32[2,8,32], index: 1, kind: input, shape index: {}]   ;;  %s4942_s2 = inlined_call_operand.hbm [shape: s32[8,8], index: 2, kind: input, shape index: {}]   ;;  %s4943_s3 = inlined_call_operand.hbm [shape: s32[8,8], index: 3, kind: input, shape index: {}]   ;;  %s4944_s4 = inlined_call_operand.vmem [shape: f32[32,96], index: 4, kind: input, shape index: {}]   ;;  %s4945_s5 = inlined_call_operand.vmem [shape: f32[1,96], index: 5, kind: input, shape index: {}]   ;;  %s4946_s6 = inlined_call_operand.vmem [shape: f32[32,32], index: 6, kind: input, shape index: {}]   ;;  %s4947_s7 = inlined_call_operand.vmem [shape: f32[1,32], index: 7, kind: input, shape index: {}]   ;;  %s4948_s8 = inlined_call_operand.vmem [shape: f32[32,32], index: 8, kind: input, shape index: {}]   ;;  %s4949_s9 = inlined_call_operand.vmem [shape: f32[1,32], index: 9, kind: input, shape index: {}]   ;;  %s4950_s10 = inlined_call_operand.hbm [shape: f32[32,64], index: 10, kind: input, shape index: {}]   ;;  %s4951_s11 = inlined_call_operand.vmem [shape: f32[1,64], index: 11, kind: input, shape index: {}]   ;;  %s4952_s12 = inlined_call_operand.hbm [shape: f32[32,32], index: 12, kind: input, shape index: {}]   ;;  %s4953_s13 = inlined_call_operand.hbm [shape: f32[1,32], index: 13, kind: input, shape index: {}]   ;;  %s4954_s14 = inlined_call_operand.hbm [shape: f32[1,32], index: 14, kind: input, shape index: {}]   ;;  %s4955_s15 = inlined_call_operand.hbm [shape: f32[1,32], index: 15, kind: input, shape index: {}]   ;;  %s4956_s16 = inlined_call_operand.hbm [shape: f32[1,32], index: 16, kind: input, shape index: {}]   ;;  %s4957_s17 = inlined_call_operand.hbm [shape: f32[1,32], index: 17, kind: input, shape index: {}]   ;;  %s4958_s18 = inlined_call_operand.hbm [shape: f32[32,64], index: 18, kind: input, shape index: {}]   ;;  %s4959_s19 = inlined_call_operand.hbm [shape: f32[1,64], index: 19, kind: input, shape index: {}]   ;;  %s4960_s20 = inlined_call_operand.vmem [shape: f32[64,32], index: 20, kind: input, shape index: {}]   ;;  %s4961_s21 = inlined_call_operand.vmem [shape: f32[1,32], index: 21, kind: input, shape index: {}]   ;;  %s4962_s22 = inlined_call_operand.vmem [shape: f32[1,32], index: 22, kind: input, shape index: {}]   ;;  %s4963_s23 = inlined_call_operand.vmem [shape: f32[1,32], index: 23, kind: input, shape index: {}]   ;;  %s4964_s24 = inlined_call_operand.hbm [shape: f32[2,8,32], index: 24, kind: output, shape index: {}]  }
   0x1   :  { %4983 = sst [smem:[#allocation34_spill]] %s4940_s0 }
   0x2   :  { %4984 = sst [smem:[#allocation35_spill]] %s4941_s1 }
   0x3   :  { %4985 = sst [smem:[#allocation36_spill]] %s4942_s2 }
   0x4   :  { %4986 = sst [smem:[#allocation37_spill]] %s4943_s3 }
   0x5   :  { %4987 = sst [smem:[#allocation38_spill]] %s4944_s4 }
   0x6   :  { %4988 = sst [smem:[#allocation39_spill]] %s4945_s5 }
   0x7   :  { %4989 = sst [smem:[#allocation40_spill]] %s4946_s6 }
   0x8   :  { %4990 = sst [smem:[#allocation41_spill]] %s4947_s7 }
   0x9   :  { %4991 = sst [smem:[#allocation42_spill]] %s4948_s8 }
   0xa   :  { %4992 = sst [smem:[#allocation43_spill]] %s4950_s10 }
   0xb   :  { %4993 = sst [smem:[#allocation44_spill]] %s4952_s12 }
   0xc   :  { %4994 = sst [smem:[#allocation45_spill]] %s4953_s13 }
   0xd   :  { %4995 = sst [smem:[#allocation46_spill]] %s4954_s14 }
   0xe   :  { %4996 = sst [smem:[#allocation47_spill]] %s4955_s15 }
   0xf   :  { %4997 = sst [smem:[#allocation48_spill]] %s4956_s16 }
  0x10   :  { %4998 = sst [smem:[#allocation49_spill]] %s4957_s17 }
  0x11   :  { %4999 = sst [smem:[#allocation50_spill]] %s4958_s18 }
  0x12   :  { %5000 = sst [smem:[#allocation51_spill]] %s4959_s19 }
  0x13   :  { %5001 = sst [smem:[#allocation52_spill]] %s4961_s21 }
  0x14   :  { %5002 = sst [smem:[#allocation53_spill]] %s4962_s22 }
  0x15   :  { %5003 = sst [smem:[#allocation54_spill]] %s4963_s23 }
  0x16   :  { %5004 = sst [smem:[#allocation55_spill]] %s4964_s24 }
  0x17   :  { %29 = vsyncpa [#allocation3], 0 }
  0x18   :  { %31 = vsyncpa [#allocation3 + $0x1], 0 }
  0x19   :  { %32 = vsyncpa [#allocation6], 0 }
  0x1a   :  { %34 = vsyncpa [#allocation6 + $0x1], 0 }
  0x1b   :  { %35 = vsyncpa [#allocation9], 0 }
  0x1c   :  { %36 = vsyncpa [#allocation12], 0 }
  0x1d   :  { %37 = vsyncpa [#allocation15], 0 }
  0x1e   :  { %38 = vsyncpa [#allocation18], 0 }
  0x1f   :  { %39 = vsyncpa [#allocation21], 0 }
  0x20   :  { %40 = vsyncpa [#allocation4], 0 }
  0x21   :  { %42 = vsyncpa [#allocation4 + $0x1], 0  ;;  %s4331_s5 = smov 0   ;;  %s4333_s26 = smov 0  }
  0x22   :  { %s4335_s27 = smov 0   ;;  %s4337_s28 = smov 0  }
  0x23 LB: > { %s4174_s6 = smov [#allocation7]   ;;  %s4352_s29 = sadd.s32 4294967295, %s4172_s28   ;;  %s4172_s28 = sphi %s4337_s28, %s5063_s28   ;;  %s4168_s27 = sphi %s4335_s27, %s5062_s27   ;;  %s4164_s26 = sphi %s4333_s26, %s5061_s26   ;;  %s4160_s5 = sphi %s4331_s5, %s5060_s5  }
  0x24   : > { %s606_s2 = sshll.u32 %s4174_s6, 4  ;;  %p3204_p0 = scmp.ge.s32.totalorder %s4172_s28, 1  ;;  %s607_s2 = int_to_ptr.vmem [resolvable:$true] %s606_s2 }
  0x25   : > { %p4971_p1 = scmp.eq.s32.totalorder %s4352_s29, 0  ;;  %p593_p2 = scmp.lt.s32.totalorder %s4172_s28, 3 }
  0x26   : > { %s4175_s7 = smov [#allocation8]   ;;  %s4176_s25 = smov [#allocation11]  }
  0x27   : > { %p4357_p3 = pnand %p3204_p0, %p593_p2  ;;  %s617_s30 = sshll.u32 %s4175_s7, 4  ;;  %s618_s30 = int_to_ptr.vmem [resolvable:$true] %s617_s30 }
  0x28   : > { %s661_s8 = sshll.u32 %s4176_s25, 4  ;;  %s3749_s1 = scalar_lea.vmem %s607_s2, 128  ;;  %s4370_s8 = int_to_ptr.vmem [resolvable:$true] %s661_s8 }
  0x29   : > { %s5005_s0 = scalar_select %p4357_p3, 1, 0 }
  0x2a   : > { %p3570_p5 = pneg %p4357_p3  ;;  %p3750_p8 = scmp.ne.s32.totalorder %s607_s2, %s3749_s1 }
  0x2b   : > { %p3757_p11 = scmp.lt.s32.totalorder %s607_s2, %s607_s2  ;;  %p3758_p12 = scmp.lt.s32.totalorder %s3749_s1, %s3749_s1 }
  0x2c   : > { %p4366_p6 = pnand %p3570_p5, %p4971_p1 }
  0x2d   : > { %p3759_p13 = por %p3758_p12, %p3757_p11 }
  0x2e   : > { %p4374_p7 = pneg %p4366_p6 }
  0x30   : > { %p3752_p9 = pnand %p3750_p8, %p4374_p7 }
  0x32   : > { %p3753_p10 = pneg %p3752_p9 }
  0x34   : > { %p3760_p0 = pnand %p3759_p13, %p3753_p10 }
  0x36   : > { %3763 = shalt.err (!%p3760_p0)
}
  0x37   : > { %s5008_s25 = sld [smem:[#allocation36_spill]]  ;;  %s3775_s24 = scalar_lea.vmem %s618_s30, 128 }
  0x38   : > { %p3776_p2 = scmp.ne.s32.totalorder %s618_s30, %s3775_s24  ;;  %p3783_p1 = scmp.lt.s32.totalorder %s618_s30, %s618_s30 }
  0x39   : > { %p3784_p8 = scmp.lt.s32.totalorder %s3775_s24, %s3775_s24 }
  0x3a   : > { %p3778_p5 = pnand %p3776_p2, %p4374_p7 }
  0x3b   : > { %p3785_p9 = por %p3784_p8, %p3783_p1 }
  0x3c   : > { %p3779_p4 = pneg %p3778_p5 }
  0x3d   : > { %3573 = dma.hbm_to_vmem [thread:$0]  (!%p4366_p6), %s5008_s25, 128, %s607_s2, [#allocation6]  }
  0x3e   : > { %p3786_p3 = pnand %p3785_p9, %p3779_p4 }
  0x40   : > { %3789 = shalt.err (!%p3786_p3)
}
  0x41   : > { %s5009_s22 = sld [smem:[#allocation37_spill]]  ;;  %s3801_s2 = scalar_lea.vmem %s4370_s8, 512 }
  0x42   : > { %p3802_p10 = scmp.ne.s32.totalorder %s4370_s8, %s3801_s2  ;;  %p3809_p13 = scmp.lt.s32.totalorder %s4370_s8, %s4370_s8 }
  0x43   : > { %p3810_p1 = scmp.lt.s32.totalorder %s3801_s2, %s3801_s2 }
  0x44   : > { %p3804_p11 = pnand %p3802_p10, %p4374_p7 }
  0x45   : > { %p3811_p4 = por %p3810_p1, %p3809_p13 }
  0x46   : > { %p3805_p12 = pneg %p3804_p11 }
  0x47   : > { %3576 = dma.hbm_to_vmem [thread:$0]  (!%p4366_p6), %s5009_s22, 128, %s618_s30, [#allocation9]  }
  0x48   : > { %p3812_p3 = pnand %p3811_p4, %p3805_p12 }
  0x4a   : > { %3815 = shalt.err (!%p3812_p3)
}
  0x4b   : > { %s4973_s24 = smov 128   ;;  %s4178_s23 = smov 8  }
  0x4c   : > { %s5010_s12 = sld [smem:[#allocation44_spill]]  ;;  %s4179_s6 = smov [#allocation14]  }
  0x4d   : > { %s686_s7 = sshll.u32 %s4179_s6, 4  ;;  %s4180_s25 = smov [#allocation17]   ;;  %s687_s7 = int_to_ptr.vmem [resolvable:$true] %s686_s7 }
  0x4e   : > { %s708_s1 = sshll.u32 %s4180_s25, 4  ;;  %s3827_s2 = scalar_lea.vmem %s687_s7, 16  ;;  %s709_s1 = int_to_ptr.vmem [resolvable:$true] %s708_s1 }
  0x4f   : > { %p3828_p0 = scmp.ne.s32.totalorder %s687_s7, %s3827_s2  ;;  %s3834_s21 = scalar_lea.vmem %s687_s7, 32 }
  0x50   : > { %p3835_p8 = scmp.lt.s32.totalorder %s687_s7, %s687_s7  ;;  %p3836_p9 = scmp.lt.s32.totalorder %s3834_s21, %s3827_s2 }
  0x51   : > { %p3830_p2 = pnand %p3828_p0, %p4374_p7 }
  0x52   : > { %3582 = dma.hbm_to_vmem [thread:$0]  (!%p4366_p6), %s5010_s12, 512, %s4370_s8, [#allocation12], %s4973_s24, %s4973_s24, %s4178_s23  }
  0x53   : > { %p3831_p5 = pneg %p3830_p2  ;;  %p3837_p10 = por %p3836_p9, %p3835_p8 }
  0x55   : > { %p3838_p11 = pnand %p3837_p10, %p3831_p5 }
  0x57   : > { %3841 = shalt.err (!%p3838_p11)
}
  0x58   : > { %s5011_s14 = sld [smem:[#allocation46_spill]]  ;;  %s3853_s30 = scalar_lea.vmem %s709_s1, 16 }
  0x59   : > { %p3854_p12 = scmp.ne.s32.totalorder %s709_s1, %s3853_s30  ;;  %s3860_s6 = scalar_lea.vmem %s709_s1, 32 }
  0x5a   : > { %p3861_p4 = scmp.lt.s32.totalorder %s709_s1, %s709_s1  ;;  %p3862_p3 = scmp.lt.s32.totalorder %s3860_s6, %s3853_s30 }
  0x5b   : > { %p3856_p13 = pnand %p3854_p12, %p4374_p7 }
  0x5c   : > { %p3863_p0 = por %p3862_p3, %p3861_p4 }
  0x5d   : > { %p3857_p1 = pneg %p3856_p13 }
  0x5e   : > { %3588 = dma.hbm_to_vmem [thread:$0]  (!%p4366_p6), %s5011_s14, 16, %s687_s7, [#allocation15]  }
  0x5f   : > { %p3864_p2 = pnand %p3863_p0, %p3857_p1 }
  0x61   : > { %3867 = shalt.err (!%p3864_p2)
}
  0x62   : > { %s5012_s16 = sld [smem:[#allocation48_spill]]  ;;  %s4181_s7 = smov [#allocation20]  }
  0x63   : > { %s729_s2 = sshll.u32 %s4181_s7, 4  ;;  %s4182_s22 = smov [#allocation10]   ;;  %s730_s2 = int_to_ptr.vmem [resolvable:$true] %s729_s2 }
  0x64   : > { %s645_s8 = sshll.u32 %s4182_s22, 4  ;;  %s3879_s24 = scalar_lea.vmem %s730_s2, 512  ;;  %s646_s8 = int_to_ptr.vmem [resolvable:$true] %s645_s8 }
  0x65   : > { %p3880_p5 = scmp.ne.s32.totalorder %s730_s2, %s3879_s24  ;;  %p3887_p10 = scmp.lt.s32.totalorder %s730_s2, %s730_s2 }
  0x66   : > { %p3888_p11 = scmp.lt.s32.totalorder %s3879_s24, %s3879_s24 }
  0x67   : > { %p3882_p8 = pnand %p3880_p5, %p4374_p7 }
  0x68   : > { %3594 = dma.hbm_to_vmem [thread:$0]  (!%p4366_p6), %s5012_s16, 16, %s709_s1, [#allocation18]  }
  0x69   : > { %p3883_p9 = pneg %p3882_p8  ;;  %p3889_p12 = por %p3888_p11, %p3887_p10 }
  0x6b   : > { %p3890_p13 = pnand %p3889_p12, %p3883_p9 }
  0x6d   : > { %3893 = shalt.err (!%p3890_p13)
}
  0x6e   : > { %s5013_s30 = smov 128   ;;  %s5014_s18 = sld [smem:[#allocation50_spill]] }
  0x6f   : > { %s3905_s21 = scalar_lea.vmem %s646_s8, 512  ;;  %p3913_p0 = scmp.lt.s32.totalorder %s646_s8, %s646_s8 }
  0x70   : > { %p3906_p1 = scmp.ne.s32.totalorder %s646_s8, %s3905_s21  ;;  %p3914_p2 = scmp.lt.s32.totalorder %s3905_s21, %s3905_s21 }
  0x72   : > { %p3908_p4 = pnand %p3906_p1, %p4374_p7  ;;  %p3915_p5 = por %p3914_p2, %p3913_p0 }
  0x74   : > { %3600 = dma.hbm_to_vmem [thread:$0]  (!%p4366_p6), %s5014_s18, 512, %s730_s2, [#allocation21], %s5013_s30, %s5013_s30, %s4178_s23  }
  0x75   : > { %p3909_p3 = pneg %p3908_p4 }
  0x77   : > { %p3916_p8 = pnand %p3915_p5, %p3909_p3 }
  0x79   : > { %3919 = shalt.err (!%p3916_p8)
}
  0x7a   : > { %s5015_s10 = sld [smem:[#allocation43_spill]]  ;;  %s4183_s7 = smov [#allocation13]  }
  0x7b   : > { %s675_s2 = sshll.u32 %s4183_s7, 4  ;;  %s4184_s22 = smov [#allocation16]   ;;  %s676_s2 = int_to_ptr.vmem [resolvable:$true] %s675_s2 }
  0x7c   : > { %s697_s1 = sshll.u32 %s4184_s22, 4  ;;  %s3931_s6 = scalar_lea.vmem %s676_s2, 16  ;;  %s698_s1 = int_to_ptr.vmem [resolvable:$true] %s697_s1 }
  0x7d   : > { %p3932_p9 = scmp.ne.s32.totalorder %s676_s2, %s3931_s6  ;;  %s3938_s21 = scalar_lea.vmem %s676_s2, 32 }
  0x7e   : > { %p3939_p12 = scmp.lt.s32.totalorder %s676_s2, %s676_s2  ;;  %p3940_p13 = scmp.lt.s32.totalorder %s3938_s21, %s3931_s6 }
  0x7f   : > { %p3934_p10 = pnand %p3932_p9, %p4374_p7 }
  0x80   : > { %3579 = dma.hbm_to_vmem [thread:$0]  (!%p4366_p6), %s5015_s10, 512, %s646_s8, [#allocation9], %s5013_s30, %s5013_s30, %s4178_s23  }
  0x81   : > { %p3935_p11 = pneg %p3934_p10  ;;  %p3941_p1 = por %p3940_p13, %p3939_p12 }
  0x83   : > { %p3942_p4 = pnand %p3941_p1, %p3935_p11 }
  0x85   : > { %3945 = shalt.err (!%p3942_p4)
}
  0x86   : > { %s5016_s13 = sld [smem:[#allocation45_spill]]  ;;  %s3957_s8 = scalar_lea.vmem %s698_s1, 16 }
  0x87   : > { %p3958_p3 = scmp.ne.s32.totalorder %s698_s1, %s3957_s8  ;;  %s3964_s30 = scalar_lea.vmem %s698_s1, 32 }
  0x88   : > { %p3965_p5 = scmp.lt.s32.totalorder %s698_s1, %s698_s1  ;;  %p3966_p8 = scmp.lt.s32.totalorder %s3964_s30, %s3957_s8 }
  0x89   : > { %p3960_p0 = pnand %p3958_p3, %p4374_p7 }
  0x8a   : > { %p3967_p9 = por %p3966_p8, %p3965_p5 }
  0x8b   : > { %p3961_p2 = pneg %p3960_p0 }
  0x8c   : > { %3585 = dma.hbm_to_vmem [thread:$0]  (!%p4366_p6), %s5016_s13, 16, %s676_s2, [#allocation12]  }
  0x8d   : > { %p3968_p10 = pnand %p3967_p9, %p3961_p2 }
  0x8f   : > { %3971 = shalt.err (!%p3968_p10)
}
  0x90   : > { %s5017_s15 = sld [smem:[#allocation47_spill]]  ;;  %s4185_s2 = smov [#allocation19]  }
  0x91   : > { %s719_s22 = sshll.u32 %s4185_s2, 4  ;;  %s4186_s6 = smov [#allocation22]   ;;  %s720_s22 = int_to_ptr.vmem [resolvable:$true] %s719_s22 }
  0x92   : > { %s743_s21 = sshll.u32 %s4186_s6, 4  ;;  %s3983_s24 = scalar_lea.vmem %s720_s22, 16  ;;  %s744_s21 = int_to_ptr.vmem [resolvable:$true] %s743_s21 }
  0x93   : > { %p3984_p11 = scmp.ne.s32.totalorder %s720_s22, %s3983_s24  ;;  %s3990_s23 = scalar_lea.vmem %s720_s22, 32 }
  0x94   : > { %p3991_p1 = scmp.lt.s32.totalorder %s720_s22, %s720_s22  ;;  %p3992_p4 = scmp.lt.s32.totalorder %s3990_s23, %s3983_s24 }
  0x95   : > { %p3986_p12 = pnand %p3984_p11, %p4374_p7 }
  0x96   : > { %3591 = dma.hbm_to_vmem [thread:$0]  (!%p4366_p6), %s5017_s15, 16, %s698_s1, [#allocation15]  }
  0x97   : > { %p3987_p13 = pneg %p3986_p12  ;;  %p3993_p3 = por %p3992_p4, %p3991_p1 }
  0x99   : > { %p3994_p0 = pnand %p3993_p3, %p3987_p13 }
  0x9b   : > { %3997 = shalt.err (!%p3994_p0)
}
  0x9c   : > { %s5018_s17 = sld [smem:[#allocation49_spill]]  ;;  %s4009_s30 = scalar_lea.vmem %s744_s21, 16 }
  0x9d   : > { %p4010_p2 = scmp.ne.s32.totalorder %s744_s21, %s4009_s30  ;;  %s4016_s25 = scalar_lea.vmem %s744_s21, 32 }
  0x9e   : > { %p4017_p9 = scmp.lt.s32.totalorder %s744_s21, %s744_s21  ;;  %p4018_p10 = scmp.lt.s32.totalorder %s4016_s25, %s4009_s30 }
  0x9f   : > { %p4012_p5 = pnand %p4010_p2, %p4374_p7 }
  0xa0   : > { %p4019_p11 = por %p4018_p10, %p4017_p9 }
  0xa1   : > { %p4013_p8 = pneg %p4012_p5 }
  0xa2   : > { %3597 = dma.hbm_to_vmem [thread:$0]  (!%p4366_p6), %s5018_s17, 16, %s720_s22, [#allocation18]  }
  0xa3   : > { %p4020_p12 = pnand %p4019_p11, %p4013_p8 }
  0xa5   : > { %4023 = shalt.err (!%p4020_p12)
}
  0xa6   : > { %s5019_s19 = sld [smem:[#allocation51_spill]]  ;;  %s3203_s4 = sadd.s32 4294967294, %s4172_s28  }
  0xa7   : > { %s4471_s3 = sadd.s32 1, %s4172_s28   ;;  %s55_s22 = sadd.s32 1, %s4168_s27 }
  0xa8   : > { %s52_s6 = ssub.s32 %s4172_s28, %s4471_s3  ;;  %p62_p7 = scmp.ne.s32.totalorder %s4168_s27, %s4164_s26 }
  0xa9   : > { %p53_p13 = scmp.eq.s32.totalorder %s52_s6, 0  ;;  %p63_p1 = scmp.eq.s32.totalorder %s4172_s28, 0 }
  0xaa   : > { %p68_p4 = scmp.ne.s32.totalorder %s4164_s26, %s4160_s5  ;;  %p580_p3 = scmp.eq.s32.totalorder %s4352_s29, 1 }
  0xab   : > { %s4483_s24 = scalar_select %p53_p13, %s4168_s27, %s55_s22  }
  0xac   : > { %3603 = dma.hbm_to_vmem [thread:$0]  (!%p4366_p6), %s5019_s19, 16, %s744_s21, [#allocation21]  }
  0xad   : > { %5020 = sst [smem:[#allocation33_spill]] %s4483_s24  ;;  %p64_p0 = por %p63_p1, %p62_p7 }
  0xae   : > { %p5021_p2 = scmp.eq.s32.totalorder %s4352_s29, 0  ;;  %p4491_p6 = por %p580_p3, %p62_p7 }
  0xaf   : > { %p586_p8 = scmp.eq.s32.totalorder %s3203_s4, 1  ;;  %p3626_p9 = scmp.lt.s32.totalorder %s4172_s28, 2 }
  0xb0   : > { %p4487_p5 = por %p5021_p2, %p68_p4  ;;  %s766_s8 = sand.u32 1, %s4168_s27  }
  0xb1   : > { %s5023_s21 = scalar_select %p4491_p6, 1, 0 }
  0xb2   : > { %s5022_s23 = scalar_select %p4487_p5, 1, 0 }
  0xb3   : > { %p4497_p10 = por %p586_p8, %p68_p4  ;;  %s4501_s30 = sshll.u32 %s766_s8, 3 }
  0xb4   : > { %s3218_s25 = sshll.u32 %s4172_s28, 7  ;;  %s5025_s22 = sld [smem:[#allocation34_spill]] }
  0xb5   : > { %s5024_s1 = scalar_select %p4497_p10, 1, 0 }
  0xb6   : > { %s770_s10 = scalar_lea.vmem [#allocation2], %s4501_s30  ;;  %p4510_p11 = pnand %p3626_p9, %p64_p0 }
  0xb7   : > { %s777_s4 = sshll.u32 %s770_s10, 4  ;;  %s5027_s15 = sld [smem:[#allocation35_spill]]  ;;  %s778_s4 = int_to_ptr.vmem [resolvable:$true] %s777_s4 }
  0xb8   : > { %s767_s7 = scalar_lea.sflag [#allocation3], %s766_s8  ;;  %p4026_p7 = pneg %p4510_p11 }
  0xba   : > { %s4507_s6 = scalar_lea.hbm %s5025_s22, %s3218_s25  ;;  %s4029_s18 = scalar_lea.hbm %s5025_s22, 256 }
  0xbb   : > { %s4024_s2 = scalar_lea.hbm %s4507_s6, 128  ;;  %p4030_p4 = scmp.lt.s32.totalorder %s4507_s6, %s5025_s22 }
  0xbc   : > { %p4025_p12 = scmp.ne.s32.totalorder %s4507_s6, %s4024_s2  ;;  %p4031_p3 = scmp.lt.s32.totalorder %s4029_s18, %s4024_s2 }
  0xbd   : > { %s4517_s16 = scalar_lea.hbm %s5027_s15, %s3218_s25 }
  0xbe   : > { %p4027_p13 = pnand %p4026_p7, %p4025_p12  ;;  %p4032_p0 = por %p4031_p3, %p4030_p4 }
  0xc0   : > { %p4028_p1 = pneg %p4027_p13 }
  0xc2   : > { %p4033_p2 = pnand %p4032_p0, %p4028_p1 }
  0xc4   : > { %4036 = shalt.err (!%p4033_p2)
}
  0xc5   : > { %s4037_s13 = scalar_lea.vmem %s778_s4, 128  ;;  %s4187_s14 = smov [#allocation2]  }
  0xc6   : > { %p4038_p8 = scmp.ne.s32.totalorder %s778_s4, %s4037_s13  ;;  %s4042_s8 = sshll.u32 %s4187_s14, 4  ;;  %s4043_s8 = int_to_ptr.vmem [resolvable:$false] %s4042_s8 }
  0xc7   : > { %s4044_s17 = scalar_lea.vmem %s4043_s8, 256  ;;  %p4045_p13 = scmp.lt.s32.totalorder %s778_s4, %s4043_s8 }
  0xc8   : > { %p4040_p9 = pnand %p4038_p8, %p4026_p7  ;;  %p4046_p10 = scmp.lt.s32.totalorder %s4044_s17, %s4037_s13 }
  0xca   : > { %p4041_p12 = pneg %p4040_p9  ;;  %p4047_p6 = por %p4046_p10, %p4045_p13 }
  0xcc   : > { %p4048_p5 = pnand %p4047_p6, %p4041_p12 }
  0xce   : > { %4051 = shalt.err (!%p4048_p5)
}
  0xcf   : > { %3607 = dma.hbm_to_vmem [thread:$0]  (!%p4510_p11), %s4507_s6, 128, %s778_s4, %s767_s7  }
  0xd0   : > { %s784_s18 = sand.u32 1, %s4172_s28   ;;  %s788_s19 = scalar_lea.vmem [#allocation5], %s4501_s30 }
  0xd1   : > { %s795_s24 = sshll.u32 %s788_s19, 4  ;;  %s785_s25 = scalar_lea.sflag [#allocation6], %s784_s18  ;;  %s796_s24 = int_to_ptr.vmem [resolvable:$true] %s795_s24 }
  0xd2   : > { %s4052_s2 = scalar_lea.hbm %s4517_s16, 128  ;;  %s4057_s14 = scalar_lea.hbm %s5027_s15, 256 }
  0xd3   : > { %p4053_p1 = scmp.ne.s32.totalorder %s4517_s16, %s4052_s2  ;;  %p4058_p10 = scmp.lt.s32.totalorder %s4517_s16, %s5027_s15 }
  0xd4   : > { %p4059_p4 = scmp.lt.s32.totalorder %s4057_s14, %s4052_s2 }
  0xd5   : > { %p4055_p5 = pnand %p4053_p1, %p4026_p7 }
  0xd6   : > { %p4060_p3 = por %p4059_p4, %p4058_p10 }
  0xd7   : > { %p4056_p6 = pneg %p4055_p5 }
  0xd9   : > { %p4061_p0 = pnand %p4060_p3, %p4056_p6 }
  0xdb   : > { %4064 = shalt.err (!%p4061_p0)
}
  0xdc   : > { %s4065_s30 = scalar_lea.vmem %s796_s24, 128  ;;  %s4188_s6 = smov [#allocation5]  }
  0xdd   : > { %p4066_p2 = scmp.ne.s32.totalorder %s796_s24, %s4065_s30  ;;  %s4070_s4 = sshll.u32 %s4188_s6, 4  ;;  %s4071_s4 = int_to_ptr.vmem [resolvable:$false] %s4070_s4 }
  0xde   : > { %s4072_s7 = scalar_lea.vmem %s4071_s4, 256  ;;  %p4073_p12 = scmp.lt.s32.totalorder %s796_s24, %s4071_s4 }
  0xdf   : > { %p4068_p8 = pnand %p4066_p2, %p4026_p7  ;;  %p4074_p13 = scmp.lt.s32.totalorder %s4072_s7, %s4065_s30 }
  0xe1   : > { %p4069_p9 = pneg %p4068_p8  ;;  %p4075_p1 = por %p4074_p13, %p4073_p12 }
  0xe3   : > { %p4076_p5 = pnand %p4075_p1, %p4069_p9 }
  0xe5   : > { %4079 = shalt.err (!%p4076_p5)
}
  0xe6   : > { %3610 = dma.hbm_to_vmem [thread:$0]  (!%p4510_p11), %s4517_s16, 128, %s796_s24, %s785_s25  }
  0xe7   : > { %p5028_p6 = scmp.ne.s32.totalorder %s5005_s0, 0 }
  0xe8   : > { %s4562_s18 = sand.u32 (!%p5028_p6), 1, %s4164_s26   ;;  %p5029_p7 = scmp.ne.s32.totalorder (!%p5028_p6), %s5022_s23, 0 }
  0xe9   : > { %804 = sbr.rel (%p5028_p6) target bundleno = 4323 (0x10e3), region = 116  ;;  %s4565_s19 = sshll.u32 (!%p5028_p6), %s4562_s18, 3 }
  0xea   : > { %s807_s2 = scalar_lea.sflag (!%p5028_p6), [#allocation3], %s4562_s18  ;;  %s810_s10 = scalar_lea.vmem (!%p5028_p6), [#allocation2], %s4565_s19 }
  0xee   : > { %4123 = dma.done.wait (%p5029_p7), %s807_s2, 128  }
  0xef   : > { %4125 = vsyncadd (%p5029_p7), %s807_s2, 4294967168  ;;  %s815_s12 = sand.u32 1, %s4352_s29   ;;  %s819_s0 = scalar_lea.vmem [#allocation5], %s4565_s19 }
  0xf0   : > { %s816_s16 = scalar_lea.sflag [#allocation6], %s815_s12 }
  0xf1   : > { %4127 = dma.done.wait (%p5029_p7), %s816_s16, 128  }
  0xf2   : > { %4129 = vsyncadd (%p5029_p7), %s816_s16, 4294967168  ;;  %p5030_p11 = scmp.eq.s32.totalorder %s4352_s29, 0 }
  0xf4   : > { %4131 = dma.done.wait (%p5030_p11), [#allocation6], 128   ;;  %p5031_p10 = pmov %p5030_p11 }
  0xf6   : > { %4133 = vsyncadd (%p5031_p10), [#allocation6], 4294967168  ;;  %p5032_p4 = pmov %p5031_p10 }
  0xf8   : > { %4135 = dma.done.wait (%p5032_p4), [#allocation9], 640   ;;  %p5033_p3 = pmov %p5032_p4 }
  0xfa   : > { %4137 = vsyncadd (%p5033_p3), [#allocation9], 4294966656  ;;  %p5034_p0 = pmov %p5033_p3 }
  0xfc   : > { %4139 = dma.done.wait (%p5034_p0), [#allocation12], 528   ;;  %p5035_p2 = pmov %p5034_p0 }
  0xfd   : > { %p5036_p8 = pmov %p5034_p0 }
  0xfe   : > { %4141 = vsyncadd (%p5035_p2), [#allocation12], 4294966768 }
  0xff   : > { %4143 = dma.done.wait (%p5036_p8), [#allocation15], 32   ;;  %p5037_p9 = pmov %p5034_p0 }
 0x100   : > { %p5038_p12 = pmov %p5034_p0 }
 0x101   : > { %4145 = vsyncadd (%p5037_p9), [#allocation15], 4294967264 }
 0x102   : > { %4147 = dma.done.wait (%p5038_p12), [#allocation18], 32   ;;  %p5039_p13 = pmov %p5034_p0 }
 0x103   : > { %p5040_p1 = pmov %p5034_p0 }
 0x104   : > { %4149 = vsyncadd (%p5039_p13), [#allocation18], 4294967264 }
 0x105   : > { %4151 = dma.done.wait (%p5040_p1), [#allocation21], 528   ;;  %p5041_p5 = pmov %p5034_p0 }
 0x106   : > { %v4189_v0 = vmov 0.0   ;;  %vm4190_vm0 = vmmov 0   ;;  %s5042_s25 = sld [smem:[#allocation38_spill]]  ;;  %v4625_v5 = vld [vmem:[%s810_s10] sm:$0xff]  ;;  %vm946_vm1 = vcmask 261120   ;;  %s4191_s10 = smov 120  }
 0x107   : > { %4153 = vsyncadd (%p5041_p5), [#allocation21], 4294966768  ;;  %3355 = vmatprep.subr.mxu1 %v4189_v0  ;;  %3363 = vmatprep.mubr.msk.f32.mxu1 %vm4190_vm0, %v4189_v0  ;;  %s5043_s2 = sld [smem:[#allocation39_spill]]  ;;  %s4192_s12 = smov 96   ;;  %vm1024_vm2 = vcmask 64512   ;;  %v1020_v17 = vld [vmem:[#allocation7] sm:$0xff] }
 0x108   : > { %3376 = vmatprep.subr.mxu0 %v4189_v0  ;;  %3378 = vmatprep.mubr.msk.f32.mxu0 %vm4190_vm0, %v4189_v0  ;;  %s4193_s16 = smov 80   ;;  %s4977_s23 = smov 88   ;;  %vm1100_vm3 = vcmp.eq.s32.totalorder %v1020_v17, 0  ;;  %vm1703_vm4 = vcmask 130048   ;;  %vm1705_vm5 = vcmask 195584   ;;  %vm2887_vm7 = vcmask 523264  }
 0x109   : > { %s4981_s24 = smov 72   ;;  %s4196_s13 = smov 112  }
 0x10a   : > { %s4197_s14 = smov 104   ;;  %s4198_s8 = smov 56  }
 0x10b   : > { %s4199_s17 = smov 64   ;;  %s4200_s30 = smov 48  }
 0x10c   : > { %v938_v1 = vld [vmem:[%s5042_s25 + $0x18] sm:$0xff]  ;;  %v937_v2 = vld [vmem:[%s5042_s25 + $0x10] sm:$0xff]  ;;  %v936_v3 = vld [vmem:[%s5042_s25 + $0x8] sm:$0xff]  ;;  %s4201_s6 = smov 40   ;;  %s5045_s4 = sld [smem:[#allocation41_spill]] }
 0x10d   : > { %3356 = vmatpush3.msra.mxu1 %v938_v1  ;;  %v935_v4 = vld [vmem:[%s5042_s25] sm:$0xff]  ;;  %s932_s7 = scalar_lea.vmem [#allocation23], %s4565_s19  ;;  %p5056_p7 = scmp.ne.s32.totalorder %s5023_s21, 0 }
 0x10e   : > { %3357 = vmatprep.subr.mxu1 %v4189_v0  ;;  %v3236_v6 = vld [vmem:[%s5043_s2] ss:$0 sm:$0xff]  ;;  %s5044_s2 = sld [smem:[#allocation40_spill]] }
 0x10f   : > { %3358 = vmatpush3.msra.mxu1 %v937_v2 }
 0x110   : > { %3359 = vmatprep.subr.mxu1 %v4189_v0 }
 0x111   : > { %3360 = vmatpush3.msra.mxu1 %v936_v3 }
 0x112   : > { %3361 = vmatprep.subr.mxu1 %v4189_v0 }
 0x113   : > { %3362 = vmatpush3.msra.mxu1 %v935_v4 }
 0x114   : > { %3364 = vmatmul.mubr.msk.f32.vlgmr.msra.gmra.mxu1 %vm946_vm1, %v4625_v5  ;;  %3366 = vmatprep.subr.mxu1 %v4189_v0  ;;  %v1709_v17 = vld [vmem:[%s5044_s2 + $0x10] sm:$0xff] }
 0x115   : > { %3368 = vmatprep.mubr.msk.f32.mxu1 %vm4190_vm0, %v4189_v0 }
 0x1d4   : > { %v1016_v7 = vpop.f32.mrf.mxu1 }
 0x1d5   : > { %v4636_v8 = vadd.f32 %v3236_v6, %v1016_v7 }
 0x1d6   : > { %v3365_v9 = vpop.f32.mrf.mxu1 }
 0x1d7   : > { %1189 = vrot.lane.b32.xlu1 %v4636_v8, %s4191_s10  ;;  %1022 = vrot.lane.b32.xlu0 %v4636_v8, %s4192_s12 }
 0x1db   : > { %1358 = vrot.lane.b32.xlu1 %v4636_v8, %s4193_s16  ;;  %1191 = vrot.lane.b32.xlu0 %v4636_v8, %s4977_s23  ;;  %s4978_s23 = smov 24  }
 0x1df   : > { %1525 = vrot.lane.b32.xlu1 %v4636_v8, %s4981_s24  ;;  %1356 = vrot.lane.b32.xlu0 %v4636_v8, %s4196_s13  ;;  %s5055_s24 = sld [smem:[#allocation55_spill]] }
 0x1e3   : > { %1523 = vrot.lane.b32.xlu0 %v4636_v8, %s4197_s14 }
 0x249   : > { %v1190_v10 = vpop.permute.xlu1 %1189  ;;  %v1023_v11 = vpop.permute.xlu0 %1022 }
 0x24a   : > { %3367 = vmatpush3.xpose.msk.msra.mxu1 %vm1024_vm2, %v1023_v11 }
 0x24b   : > { %3371 = vmatprep.subr.mxu1 %v4189_v0 }
 0x24d   : > { %3369 = vmatmul.mubr.msk.f32.vlgmr.msra.gmra.mxu1 %vm1024_vm2, %v4636_v8  ;;  %v1192_v12 = vpop.permute.xlu0 %1191  ;;  %v1359_v13 = vpop.permute.xlu1 %1358 }
 0x24e   : > { %3377 = vmatpush3.xpose.msk.msra.mxu0 %vm1024_vm2, %v1192_v12  ;;  %3373 = vmatprep.mubr.msk.f32.mxu1 %vm4190_vm0, %v4189_v0  ;;  %v1710_v12 = vld [vmem:[%s5044_s2 + $0x18] sm:$0xff] }
 0x24f   : > { %3386 = vmatprep.subr.mxu0 %v4189_v0 }
 0x251   : > { %3379 = vmatmul.mubr.msk.f32.vlgmr.msra.gmra.mxu0 %vm1024_vm2, %v1190_v10  ;;  %v1357_v14 = vpop.permute.xlu0 %1356  ;;  %v1526_v15 = vpop.permute.xlu1 %1525 }
 0x252   : > { %3387 = vmatpush3.xpose.msk.msra.mxu0 %vm1024_vm2, %v1359_v13  ;;  %3388 = vmatprep.mubr.msk.f32.mxu0 %vm4190_vm0, %v4189_v0 }
 0x253   : > { %3396 = vmatprep.subr.mxu0 %v4189_v0 }
 0x255   : > { %3389 = vmatmul.mubr.msk.f32.vlgmr.msra.gmra.mxu0 %vm1024_vm2, %v1357_v14  ;;  %v1524_v16 = vpop.permute.xlu0 %1523 }
 0x256   : > { %3397 = vmatpush3.xpose.msk.msra.mxu0 %vm1024_vm2, %v1526_v15  ;;  %3398 = vmatprep.mubr.msk.f32.mxu0 %vm4190_vm0, %v4189_v0 }
 0x257   : > { %3406 = vmatprep.subr.mxu0 %v4189_v0 }
 0x259   : > { %3399 = vmatmul.mubr.msk.f32.vlgmr.msra.gmra.mxu0 %vm1024_vm2, %v1524_v16 }
 0x25a   : > { %3414 = vmatprep.mubr.msk.f32.mxu0 %vm4190_vm0, %v4189_v0  ;;  %3407 = vmatpush3.msra.mxu0 %v1710_v12 }
 0x25b   : > { %3408 = vmatprep.subr.mxu0 %v4189_v0 }
 0x25c   : > { %3409 = vmatpush3.msra.mxu0 %v1709_v17 }
 0x25d   : > { %3410 = vmatprep.subr.mxu0 %v4189_v0 }
 0x30d   : > { %v1095_v18 = vpop.f32.mrf.mxu1 }
 0x30e   : > { %v1099_v19 = vmul.f32 0.35355338, %v1095_v18  ;;  %v1708_v18 = vld [vmem:[%s5044_s2 + $0x8] sm:$0xff] }
 0x30f   : > { %v3370_v20 = vpop.f32.mrf.mxu1  ;;  %3411 = vmatpush3.msra.mxu0 %v1708_v18 }
 0x310   : > { %v1101_v21 = vsel %vm1100_vm3, -1e+09, %v1099_v19  ;;  %3412 = vmatprep.subr.mxu0 %v4189_v0  ;;  %v1707_v19 = vld [vmem:[%s5044_s2] sm:$0xff]  ;;  %s2993_s2 = scalar_lea.sflag [#allocation4], %s4562_s18 }
 0x311   : > { %v1263_v22 = vpop.f32.mrf.mxu0  ;;  %v1102_v23 = vsel %vm1024_vm2, %v1101_v21, -inf  ;;  %3413 = vmatpush3.msra.mxu0 %v1707_v19 }
 0x312   : > { %v1267_v24 = vmul.f32 0.35355338, %v1263_v22  ;;  %1103 = vmax.xlane.f32.xlu1 %v1102_v23  ;;  %3428 = vmatprep.subr.mxu0 %v4189_v0 }
 0x313   : > { %v3380_v25 = vpop.f32.mrf.mxu0 }
 0x314   : > { %v1268_v26 = vsel %vm1100_vm3, -1e+09, %v1267_v24 }
 0x315   : > { %v1430_v27 = vpop.f32.mrf.mxu0  ;;  %v1269_v28 = vsel %vm1024_vm2, %v1268_v26, -inf }
 0x316   : > { %v1434_v29 = vmul.f32 0.35355338, %v1430_v27  ;;  %1270 = vmax.xlane.f32.xlu0 %v1269_v28 }
 0x317   : > { %v3390_v30 = vpop.f32.mrf.mxu0 }
 0x318   : > { %v1435_v31 = vsel %vm1100_vm3, -1e+09, %v1434_v29  ;;  %v3250_v30 = vld [vmem:[%s5045_s4] ss:$0 sm:$0xff] }
 0x319   : > { %v1597_v32 = vpop.f32.mrf.mxu0  ;;  %v1436_v33 = vsel %vm1024_vm2, %v1435_v31, -inf }
 0x31a   : > { %v1601_v34 = vmul.f32 0.35355338, %v1597_v32  ;;  %1437 = vmax.xlane.f32.xlu0 %v1436_v33 }
 0x31b   : > { %v3400_v35 = vpop.f32.mrf.mxu0 }
 0x31c   : > { %v1602_v36 = vsel %vm1100_vm3, -1e+09, %v1601_v34 }
 0x31d   : > { %v1603_v37 = vsel %vm1024_vm2, %v1602_v36, -inf }
 0x31e   : > { %1604 = vmax.xlane.f32.xlu1 %v1603_v37 }
 0x32f   : > { %1280 = vrot.lane.b32.xlu1 %v4636_v8, %s4198_s8  ;;  %s4980_s8 = smov 8  }
 0x39b   : > { %v1104_v38 = vpop.xlane.xlu1 %1103 }
 0x39c   : > { %v1105_v39 = vsub.f32 %v1101_v21, %v1104_v38 }
 0x39e   : > { %v1106_v40 = vmul.f32 1.442695, %v1105_v39 }
 0x39f   : > { %v1271_v41 = vpop.xlane.xlu0 %1270 }
 0x3a0   : > { %3700 = vpow2.f32 %v1106_v40  ;;  %v1272_v42 = vsub.f32 %v1268_v26, %v1271_v41  ;;  %v1909_v41 = vld [vmem:[#allocation10 + $0x18] sm:$0xff] }
 0x3a2   : > { %v1273_v43 = vmul.f32 1.442695, %v1272_v42  ;;  %v1908_v42 = vld [vmem:[#allocation10 + $0x10] sm:$0xff] }
 0x3a3   : > { %v1438_v53 = vpop.xlane.xlu0 %1437 }
 0x3a4   : > { %3702 = vpow2.f32 %v1273_v43  ;;  %v1439_v54 = vsub.f32 %v1435_v31, %v1438_v53  ;;  %v1906_v43 = vld [vmem:[#allocation10] sm:$0xff] }
 0x3a5   : > { %v3252_v53 = vld [vmem:[#allocation14] ss:$0 sm:$0xff] }
 0x3a6   : > { %v1440_v55 = vmul.f32 1.442695, %v1439_v54 }
 0x3a7   : > { %v1605_v44 = vpop.xlane.xlu1 %1604 }
 0x3a8   : > { %v1606_v45 = vsub.f32 %v1602_v36, %v1605_v44  ;;  %v934_v44 = vld [vmem:[%s819_s0] sm:$0xff] }
 0x3aa   : > { %v1607_v46 = vmul.f32 1.442695, %v1606_v45 }
 0x3ab   : > { %v1281_v58 = vpop.permute.xlu1 %1280 }
 0x3ac   : > { %3704 = vpow2.f32 %v1607_v46 }
 0x3ad   : > { %v3701_v47 = vpop.eup %3700  ;;  %3706 = vpow2.f32 %v1440_v55  ;;  %v3253_v55 = vld [vmem:[#allocation16] ss:$0 sm:$0xff] }
 0x3ae   : > { %v1108_v48 = vsel %vm1024_vm2, %v3701_v47, 0.0 }
 0x3af   : > { %1109 = vadd.xlane.f32.xlu0 %v1108_v48 }
 0x3b1   : > { %v3703_v49 = vpop.eup %3702 }
 0x3b2   : > { %v1275_v50 = vsel %vm1024_vm2, %v3703_v49, 0.0 }
 0x3b3   : > { %1276 = vadd.xlane.f32.xlu1 %v1275_v50 }
 0x3b9   : > { %v3705_v51 = vpop.eup %3704 }
 0x3ba   : > { %v1609_v52 = vsel %vm1024_vm2, %v3705_v51, 0.0  ;;  %v3707_v56 = vpop.eup %3706 }
 0x3bb   : > { %1610 = vadd.xlane.f32.xlu1 %v1609_v52  ;;  %v1442_v57 = vsel %vm1024_vm2, %v3707_v56, 0.0 }
 0x3c5   : > { %1113 = vrot.lane.b32.xlu0 %v4636_v8, %s4199_s17  ;;  %s4979_s17 = smov 16  }
 0x3cc   : > { %1447 = vrot.lane.b32.xlu1 %v4636_v8, %s4200_s30  ;;  %s3006_s30 = sshll.u32 %s932_s7, 4  ;;  %s3007_s30 = int_to_ptr.vmem [resolvable:$true] %s3006_s30 }
 0x3e4   : > { %1443 = vadd.xlane.f32.xlu0 %v1442_v57 }
 0x3fa   : > { %1614 = vrot.lane.b32.xlu0 %v4636_v8, %s4201_s6  ;;  %s5046_s6 = sld [smem:[#allocation42_spill]] }
 0x400   : > { %v1825_v45 = vld [vmem:[%s5046_s6 + $0x18] sm:$0xff]  ;;  %v1824_v46 = vld [vmem:[%s5046_s6 + $0x10] sm:$0xff]  ;;  %v1822_v48 = vld [vmem:[%s5046_s6] sm:$0xff] }
 0x438   : > { %v1110_v59 = vpop.xlane.xlu0 %1109 }
 0x439   : > { %3708 = vrcp.f32 %v1110_v59 }
 0x43c   : > { %v1114_v60 = vpop.permute.xlu0 %1113  ;;  %v1277_v61 = vpop.xlane.xlu1 %1276 }
 0x43d   : > { %3710 = vrcp.f32 %v1277_v61  ;;  %3372 = vmatpush3.msra.mxu1 %v1114_v60 }
 0x43e   : > { %3381 = vmatprep.subr.mxu1 %v4189_v0 }
 0x444   : > { %v1611_v63 = vpop.xlane.xlu1 %1610 }
 0x446   : > { %v3709_v62 = vpop.eup %3708 }
 0x447   : > { %v1112_v1 = vmul.f32 %v3709_v62, %v3701_v47  ;;  %v1823_v47 = vld [vmem:[%s5046_s6 + $0x8] sm:$0xff] }
 0x448   : > { %v1448_v4 = vpop.permute.xlu1 %1447 }
 0x449   : > { %3374 = vmatmul.mubr.msk.f32.vlgmr.msra.gmra.mxu1 %vm1024_vm2, %v1112_v1 }
 0x44a   : > { %v3711_v2 = vpop.eup %3710  ;;  %3382 = vmatpush3.msra.mxu1 %v1281_v58  ;;  %3383 = vmatprep.mubr.msk.f32.mxu1 %vm4190_vm0, %v4189_v0  ;;  %v3256_v58 = vld [vmem:[%s4951_s11] ss:$0 sm:$0xff] }
 0x44b   : > { %3391 = vmatprep.subr.mxu1 %v4189_v0  ;;  %v1279_v3 = vmul.f32 %v3711_v2, %v3703_v49 }
 0x44d   : > { %3384 = vmatmul.mubr.msk.f32.vlgmr.msra.gmra.mxu1 %vm1024_vm2, %v1279_v3 }
 0x44e   : > { %3392 = vmatpush3.msra.mxu1 %v1448_v4  ;;  %3393 = vmatprep.mubr.msk.f32.mxu1 %vm4190_vm0, %v4189_v0 }
 0x44f   : > { %3401 = vmatprep.subr.mxu1 %v4189_v0 }
 0x46d   : > { %v1444_v6 = vpop.xlane.xlu0 %1443 }
 0x46e   : > { %3712 = vrcp.f32 %v1444_v6 }
 0x46f   : > { %3714 = vrcp.f32 %v1611_v63  ;;  %v3254_v63 = vld [vmem:[%s4949_s9] ss:$0 sm:$0xff] }
 0x471   : > { %v1615_v10 = vpop.permute.xlu0 %1614 }
 0x47b   : > { %v3713_v7 = vpop.eup %3712 }
 0x47c   : > { %v1446_v8 = vmul.f32 %v3713_v7, %v3707_v56  ;;  %v3715_v9 = vpop.eup %3714 }
 0x47d   : > { %v1613_v11 = vmul.f32 %v3715_v9, %v3705_v51 }
 0x47e   : > { %3394 = vmatmul.mubr.msk.f32.vlgmr.msra.gmra.mxu1 %vm1024_vm2, %v1446_v8 }
 0x47f   : > { %3402 = vmatpush3.msra.mxu1 %v1615_v10  ;;  %3403 = vmatprep.mubr.msk.f32.mxu1 %vm4190_vm0, %v4189_v0  ;;  %v1990_v10 = vld [vmem:[#allocation8] sm:$0xff] }
 0x480   : > { %3417 = vmatprep.subr.mxu1 %v4189_v0  ;;  %vm2068_vm6 = vcmp.eq.s32.totalorder %v1990_v10, 0  ;;  %v2673_v10 = vld [vmem:[#allocation11] sm:$0xff] }
 0x482   : > { %3404 = vmatmul.mubr.msk.f32.vlgmr.msra.gmra.mxu1 %vm1024_vm2, %v1613_v11 }
 0x483   : > { %3425 = vmatprep.mubr.msk.f32.mxu1 %vm4190_vm0, %v4189_v0  ;;  %3418 = vmatpush3.msra.mxu1 %v1825_v45 }
 0x484   : > { %3419 = vmatprep.subr.mxu1 %v4189_v0 }
 0x485   : > { %3420 = vmatpush3.msra.mxu1 %v1824_v46 }
 0x486   : > { %3421 = vmatprep.subr.mxu1 %v4189_v0 }
 0x487   : > { %3422 = vmatpush3.msra.mxu1 %v1823_v47 }
 0x488   : > { %3423 = vmatprep.subr.mxu1 %v4189_v0 }
 0x489   : > { %3424 = vmatpush3.msra.mxu1 %v1822_v48 }
 0x48a   : > { %3439 = vmatprep.subr.mxu1 %v4189_v0 }
 0x509   : > { %v1185_v13 = vpop.f32.mrf.mxu1 }
 0x50b   : > { %v3375_v14 = vpop.f32.mrf.mxu1 }
 0x50d   : > { %v1352_v15 = vpop.f32.mrf.mxu1 }
 0x50e   : > { %1691 = vrot.lane.b32.xlu1 %v1352_v15, %s4980_s8  ;;  %s5052_s8 = sld [smem:[#allocation52_spill]] }
 0x50f   : > { %v3385_v16 = vpop.f32.mrf.mxu1 }
 0x53e   : > { %v1519_v20 = vpop.f32.mrf.mxu1 }
 0x53f   : > { %1695 = vrot.lane.b32.xlu0 %v1519_v20, %s4979_s17  ;;  %s4080_s17 = scalar_lea.vmem %s3007_s30, 128 }
 0x540   : > { %v3395_v21 = vpop.f32.mrf.mxu1  ;;  %p4081_p6 = scmp.ne.s32.totalorder %s3007_s30, %s4080_s17 }
 0x542   : > { %v1686_v22 = vpop.f32.mrf.mxu1  ;;  %p4082_p11 = pnand %p4081_p6, %p5056_p7 }
 0x543   : > { %1699 = vrot.lane.b32.xlu1 %v1686_v22, %s4978_s23  ;;  %s4205_s23 = smov [#allocation23]  }
 0x544   : > { %v3405_v23 = vpop.f32.mrf.mxu1  ;;  %p4083_p10 = pneg %p4082_p11 }
 0x580   : > { %v1692_v24 = vpop.permute.xlu1 %1691 }
 0x581   : > { %v1702_v26 = vsel %vm1024_vm2, %v1185_v13, %v1692_v24 }
 0x5b1   : > { %v1696_v25 = vpop.permute.xlu0 %1695 }
 0x5b2   : > { %v1704_v27 = vsel %vm1703_vm4, %v1702_v26, %v1696_v25 }
 0x5b5   : > { %v1700_v28 = vpop.permute.xlu1 %1699 }
 0x5b6   : > { %v1706_v29 = vsel %vm1705_vm5, %v1704_v27, %v1700_v28 }
 0x5b7   : > { %3415 = vmatmul.mubr.msk.f32.vlgmr.msra.gmra.mxu0 %vm946_vm1, %v1706_v29 }
 0x5b8   : > { %3436 = vmatprep.mubr.msk.f32.mxu0 %vm4190_vm0, %v4189_v0  ;;  %3429 = vmatpush3.msra.mxu0 %v1909_v41 }
 0x5b9   : > { %3430 = vmatprep.subr.mxu0 %v4189_v0 }
 0x5ba   : > { %3431 = vmatpush3.msra.mxu0 %v1908_v42 }
 0x5bb   : > { %3432 = vmatprep.subr.mxu0 %v4189_v0 }
 0x677   : > { %v1787_v31 = vpop.f32.mrf.mxu0 }
 0x678   : > { %v1788_v32 = vadd.f32 %v3250_v30, %v1787_v31 }
 0x679   : > { %v3416_v33 = vpop.f32.mrf.mxu0 }
 0x67a   : > { %v1793_v34 = vadd.f32 %v1788_v32, %v4625_v5  ;;  %v1907_v5 = vld [vmem:[#allocation10 + $0x8] sm:$0xff] }
 0x67b   : > { %3433 = vmatpush3.msra.mxu0 %v1907_v5 }
 0x67c   : > { %v1794_v35 = vsel %vm946_vm1, %v1793_v34, 0.0  ;;  %3434 = vmatprep.subr.mxu0 %v4189_v0 }
 0x67d   : > { %1795 = vadd.xlane.f32.xlu0 %v1794_v35  ;;  %3435 = vmatpush3.msra.mxu0 %v1906_v43 }
 0x67e   : > { %3437 = vmatmul.mubr.msk.f32.vlgmr.msra.gmra.mxu0 %vm946_vm1, %v934_v44  ;;  %3449 = vmatprep.subr.mxu0 %v4189_v0 }
 0x67f   : > { %3451 = vmatprep.mubr.msk.f32.mxu0 %vm4190_vm0, %v4189_v0 }
 0x706   : > { %v1796_v36 = vpop.xlane.xlu0 %1795 }
 0x707   : > { %v1798_v37 = vmul.f32 0.03125, %v1796_v36 }
 0x709   : > { %v1799_v38 = vsub.f32 %v1793_v34, %v1798_v37 }
 0x70b   : > { %v1800_v39 = vmul.f32 %v1799_v38, %v1799_v38 }
 0x70d   : > { %v1801_v40 = vsel %vm946_vm1, %v1800_v39, 0.0 }
 0x70e   : > { %1802 = vadd.xlane.f32.xlu1 %v1801_v40 }
 0x73e   : > { %v1986_v59 = vpop.f32.mrf.mxu0 }
 0x73f   : > { %v4770_v60 = vadd.f32 %v3256_v58, %v1986_v59 }
 0x740   : > { %v3438_v61 = vpop.f32.mrf.mxu0 }
 0x741   : > { %2159 = vrot.lane.b32.xlu0 %v4770_v60, %s4191_s10 }
 0x745   : > { %2326 = vrot.lane.b32.xlu0 %v4770_v60, %s4196_s13 }
 0x749   : > { %2493 = vrot.lane.b32.xlu0 %v4770_v60, %s4197_s14 }
 0x797   : > { %v1803_v49 = vpop.xlane.xlu1 %1802 }
 0x798   : > { %v1804_v50 = vmul.f32 0.03125, %v1803_v49 }
 0x79a   : > { %v1805_v51 = vadd.f32 1e-05, %v1804_v50 }
 0x79c   : > { %3716 = vrsqrt.f32 %v1805_v51 }
 0x7a9   : > { %v3717_v52 = vpop.eup %3716 }
 0x7aa   : > { %v1807_v54 = vmul.f32 %v3717_v52, %v1799_v38 }
 0x7ac   : > { %v1814_v56 = vmul.f32 %v3252_v53, %v1807_v54 }
 0x7ae   : > { %v4761_v57 = vadd.f32 %v3253_v55, %v1814_v56 }
 0x7b0   : > { %3426 = vmatmul.mubr.msk.f32.vlgmr.msra.gmra.mxu1 %vm946_vm1, %v4761_v57 }
 0x7b1   : > { %3441 = vmatprep.mubr.msk.f32.mxu1 %vm4190_vm0, %v4189_v0  ;;  %3440 = vmatpush3.xpose.msk.msra.mxu1 %vm1024_vm2, %v4770_v60 }
 0x7b2   : > { %3444 = vmatprep.subr.mxu1 %v4189_v0 }
 0x7b3   : > { %v2160_v62 = vpop.permute.xlu0 %2159 }
 0x7b4   : > { %3450 = vmatpush3.xpose.msk.msra.mxu0 %vm1024_vm2, %v2160_v62 }
 0x7b5   : > { %3459 = vmatprep.subr.mxu0 %v4189_v0 }
 0x7b7   : > { %v2327_v4 = vpop.permute.xlu0 %2326 }
 0x7bb   : > { %v2494_v8 = vpop.permute.xlu0 %2493 }
 0x870   : > { %v1902_v1 = vpop.f32.mrf.mxu1 }
 0x871   : > { %v1903_v2 = vadd.f32 %v3254_v63, %v1902_v1 }
 0x872   : > { %v3427_v3 = vpop.f32.mrf.mxu1 }
 0x873   : > { %2157 = vrot.lane.b32.xlu1 %v1903_v2, %s4191_s10  ;;  %3442 = vmatmul.mubr.msk.f32.vlgmr.msra.gmra.mxu1 %vm1024_vm2, %v1903_v2  ;;  %s5047_s10 = smov 72  }
 0x874   : > { %3446 = vmatprep.mubr.msk.f32.mxu1 %vm4190_vm0, %v4189_v0 }
 0x877   : > { %2324 = vrot.lane.b32.xlu1 %v1903_v2, %s4196_s13  ;;  %s5050_s13 = smov 16  }
 0x87b   : > { %2491 = vrot.lane.b32.xlu1 %v1903_v2, %s4197_s14  ;;  %s5051_s14 = smov 24  }
 0x8e5   : > { %v2158_v6 = vpop.permute.xlu1 %2157 }
 0x8e6   : > { %3452 = vmatmul.mubr.msk.f32.vlgmr.msra.gmra.mxu0 %vm1024_vm2, %v2158_v6 }
 0x8e7   : > { %3460 = vmatpush3.xpose.msk.msra.mxu0 %vm1024_vm2, %v2327_v4  ;;  %3461 = vmatprep.mubr.msk.f32.mxu0 %vm4190_vm0, %v4189_v0 }
 0x8e8   : > { %3469 = vmatprep.subr.mxu0 %v4189_v0 }
 0x8e9   : > { %v2325_v7 = vpop.permute.xlu1 %2324 }
 0x8ea   : > { %3462 = vmatmul.mubr.msk.f32.vlgmr.msra.gmra.mxu0 %vm1024_vm2, %v2325_v7  ;;  %v2676_v7 = vld [vmem:[#allocation11 + $0x18] sm:$0xff] }
 0x8eb   : > { %3470 = vmatpush3.xpose.msk.msra.mxu0 %vm1024_vm2, %v2494_v8  ;;  %3471 = vmatprep.mubr.msk.f32.mxu0 %vm4190_vm0, %v4189_v0  ;;  %v2675_v8 = vld [vmem:[#allocation11 + $0x10] sm:$0xff] }
 0x8ec   : > { %3479 = vmatprep.subr.mxu0 %v4189_v0 }
 0x8ed   : > { %v2492_v9 = vpop.permute.xlu1 %2491 }
 0x8ee   : > { %3472 = vmatmul.mubr.msk.f32.vlgmr.msra.gmra.mxu0 %vm1024_vm2, %v2492_v9  ;;  %v2674_v9 = vld [vmem:[#allocation11 + $0x8] sm:$0xff] }
 0x8ef   : > { %3487 = vmatprep.mubr.msk.f32.mxu0 %vm4190_vm0, %v4189_v0  ;;  %3480 = vmatpush3.msra.mxu0 %v2676_v7 }
 0x8f0   : > { %3481 = vmatprep.subr.mxu0 %v4189_v0 }
 0x8f1   : > { %3482 = vmatpush3.msra.mxu0 %v2675_v8 }
 0x8f2   : > { %3483 = vmatprep.subr.mxu0 %v4189_v0 }
 0x8f3   : > { %3484 = vmatpush3.msra.mxu0 %v2674_v9 }
 0x8f4   : > { %3485 = vmatprep.subr.mxu0 %v4189_v0 }
 0x8f5   : > { %3486 = vmatpush3.msra.mxu0 %v2673_v10 }
 0x8f6   : > { %3501 = vmatprep.subr.mxu0 %v4189_v0 }
 0x933   : > { %v2063_v11 = vpop.f32.mrf.mxu1 }
 0x934   : > { %v2067_v12 = vmul.f32 0.35355338, %v2063_v11 }
 0x935   : > { %v3443_v13 = vpop.f32.mrf.mxu1 }
 0x936   : > { %v2069_v14 = vsel %vm2068_vm6, -1e+09, %v2067_v12 }
 0x937   : > { %v2070_v15 = vsel %vm1024_vm2, %v2069_v14, -inf }
 0x938   : > { %2071 = vmax.xlane.f32.xlu0 %v2070_v15 }
 0x9a6   : > { %v2231_v16 = vpop.f32.mrf.mxu0 }
 0x9a7   : > { %v2235_v17 = vmul.f32 0.35355338, %v2231_v16 }
 0x9a8   : > { %v3453_v18 = vpop.f32.mrf.mxu0 }
 0x9a9   : > { %v2236_v19 = vsel %vm2068_vm6, -1e+09, %v2235_v17 }
 0x9aa   : > { %v2398_v20 = vpop.f32.mrf.mxu0  ;;  %v2237_v21 = vsel %vm1024_vm2, %v2236_v19, -inf }
 0x9ab   : > { %v2402_v22 = vmul.f32 0.35355338, %v2398_v20  ;;  %2238 = vmax.xlane.f32.xlu1 %v2237_v21 }
 0x9ac   : > { %v3463_v23 = vpop.f32.mrf.mxu0 }
 0x9ad   : > { %v2403_v24 = vsel %vm2068_vm6, -1e+09, %v2402_v22  ;;  %v3270_v23 = vld [vmem:[#allocation13] ss:$0 sm:$0xff] }
 0x9ae   : > { %v2565_v25 = vpop.f32.mrf.mxu0  ;;  %v2404_v26 = vsel %vm1024_vm2, %v2403_v24, -inf }
 0x9af   : > { %v2569_v27 = vmul.f32 0.35355338, %v2565_v25  ;;  %2405 = vmax.xlane.f32.xlu0 %v2404_v26 }
 0x9b0   : > { %v3473_v28 = vpop.f32.mrf.mxu0 }
 0x9b1   : > { %v2570_v29 = vsel %vm2068_vm6, -1e+09, %v2569_v27 }
 0x9b2   : > { %v2571_v30 = vsel %vm1024_vm2, %v2570_v29, -inf }
 0x9b3   : > { %2572 = vmax.xlane.f32.xlu0 %v2571_v30 }
 0x9bc   : > { %2081 = vrot.lane.b32.xlu1 %v4770_v60, %s4192_s12  ;;  %s5048_s12 = smov 88  }
 0x9c1   : > { %v2072_v31 = vpop.xlane.xlu0 %2071 }
 0x9c2   : > { %v2073_v32 = vsub.f32 %v2069_v14, %v2072_v31 }
 0x9c4   : > { %v2074_v33 = vmul.f32 1.442695, %v2073_v32 }
 0x9c6   : > { %3718 = vpow2.f32 %v2074_v33 }
 0x9d3   : > { %v3719_v34 = vpop.eup %3718 }
 0x9d4   : > { %v2076_v35 = vsel %vm1024_vm2, %v3719_v34, 0.0 }
 0x9e0   : > { %2077 = vadd.xlane.f32.xlu1 %v2076_v35  ;;  %v2789_v35 = vld [vmem:[#allocation20 + $0x10] sm:$0xff] }
 0xa34   : > { %v2239_v36 = vpop.xlane.xlu1 %2238 }
 0xa35   : > { %v2240_v37 = vsub.f32 %v2236_v19, %v2239_v36  ;;  %v2788_v36 = vld [vmem:[#allocation20 + $0x8] sm:$0xff] }
 0xa37   : > { %v2241_v38 = vmul.f32 1.442695, %v2240_v37  ;;  %v2879_v37 = vld [vmem:[%s4960_s20 + $0x38] sm:$0xff] }
 0xa38   : > { %v2082_v39 = vpop.permute.xlu1 %2081  ;;  %v2406_v40 = vpop.xlane.xlu0 %2405 }
 0xa39   : > { %3720 = vpow2.f32 %v2241_v38  ;;  %v2407_v41 = vsub.f32 %v2403_v24, %v2406_v40  ;;  %3445 = vmatpush3.msra.mxu1 %v2082_v39  ;;  %v2878_v38 = vld [vmem:[%s4960_s20 + $0x30] sm:$0xff]  ;;  %v2877_v39 = vld [vmem:[%s4960_s20 + $0x28] sm:$0xff]  ;;  %v2876_v40 = vld [vmem:[%s4960_s20 + $0x20] sm:$0xff] }
 0xa3a   : > { %3454 = vmatprep.subr.mxu1 %v4189_v0 }
 0xa3b   : > { %v2408_v42 = vmul.f32 1.442695, %v2407_v41  ;;  %v2875_v41 = vld [vmem:[%s4960_s20 + $0x18] sm:$0xff] }
 0xa3c   : > { %v2573_v5 = vpop.xlane.xlu0 %2572 }
 0xa3d   : > { %3722 = vpow2.f32 %v2408_v42  ;;  %v2574_v43 = vsub.f32 %v2570_v29, %v2573_v5 }
 0xa3f   : > { %v2575_v44 = vmul.f32 1.442695, %v2574_v43 }
 0xa41   : > { %3724 = vpow2.f32 %v2575_v44 }
 0xa46   : > { %v3721_v45 = vpop.eup %3720 }
 0xa47   : > { %v2243_v46 = vsel %vm1024_vm2, %v3721_v45, 0.0 }
 0xa48   : > { %2244 = vadd.xlane.f32.xlu0 %v2243_v46 }
 0xa4a   : > { %v3723_v47 = vpop.eup %3722 }
 0xa4b   : > { %v2410_v48 = vsel %vm1024_vm2, %v3723_v47, 0.0 }
 0xa4c   : > { %2411 = vadd.xlane.f32.xlu1 %v2410_v48 }
 0xa4e   : > { %v3725_v49 = vpop.eup %3724 }
 0xa4f   : > { %v2577_v50 = vsel %vm1024_vm2, %v3725_v49, 0.0 }
 0xa50   : > { %2578 = vadd.xlane.f32.xlu0 %v2577_v50  ;;  %v2874_v50 = vld [vmem:[%s4960_s20 + $0x10] sm:$0xff] }
 0xa5d   : > { %2415 = vrot.lane.b32.xlu1 %v4770_v60, %s4193_s16  ;;  %s5049_s16 = smov 8  }
 0xa61   : > { %2582 = vrot.lane.b32.xlu1 %v4770_v60, %s5047_s10  ;;  %s5053_s10 = sld [smem:[#allocation53_spill]] }
 0xa66   : > { %2248 = vrot.lane.b32.xlu0 %v4770_v60, %s5048_s12 }
 0xa69   : > { %v2078_v51 = vpop.xlane.xlu1 %2077 }
 0xa6a   : > { %3726 = vrcp.f32 %v2078_v51  ;;  %v2873_v51 = vld [vmem:[%s4960_s20 + $0x8] sm:$0xff] }
 0xa77   : > { %v3727_v52 = vpop.eup %3726 }
 0xa78   : > { %v2080_v53 = vmul.f32 %v3727_v52, %v3719_v34  ;;  %v2790_v34 = vld [vmem:[#allocation20 + $0x18] sm:$0xff]  ;;  %v2872_v52 = vld [vmem:[%s4960_s20] sm:$0xff] }
 0xa7a   : > { %3447 = vmatmul.mubr.msk.f32.vlgmr.msra.gmra.mxu1 %vm1024_vm2, %v2080_v53  ;;  %v3274_v53 = vld [vmem:[#allocation22] ss:$0 sm:$0xff] }
 0xa7b   : > { %3456 = vmatprep.mubr.msk.f32.mxu1 %vm4190_vm0, %v4189_v0 }
 0xad1   : > { %v2245_v54 = vpop.xlane.xlu0 %2244 }
 0xad2   : > { %3728 = vrcp.f32 %v2245_v54 }
 0xad5   : > { %v2412_v55 = vpop.xlane.xlu1 %2411 }
 0xad6   : > { %3730 = vrcp.f32 %v2412_v55 }
 0xad9   : > { %v2579_v56 = vpop.xlane.xlu0 %2578  ;;  %v2416_v60 = vpop.permute.xlu1 %2415 }
 0xada   : > { %3732 = vrcp.f32 %v2579_v56 }
 0xadd   : > { %v2249_v58 = vpop.permute.xlu0 %2248  ;;  %v2583_v1 = vpop.permute.xlu1 %2582 }
 0xade   : > { %3455 = vmatpush3.msra.mxu1 %v2249_v58 }
 0xadf   : > { %v3729_v59 = vpop.eup %3728  ;;  %3464 = vmatprep.subr.mxu1 %v4189_v0 }
 0xae0   : > { %v2247_v61 = vmul.f32 %v3729_v59, %v3721_v45  ;;  %v3272_v45 = vld [vmem:[#allocation17] ss:$0 sm:$0xff]  ;;  %v3276_v59 = vld [vmem:[%s5052_s8] ss:$0 sm:$0xff] }
 0xae2   : > { %3457 = vmatmul.mubr.msk.f32.vlgmr.msra.gmra.mxu1 %vm1024_vm2, %v2247_v61 }
 0xae3   : > { %v3731_v62 = vpop.eup %3730  ;;  %3465 = vmatpush3.msra.mxu1 %v2416_v60  ;;  %3466 = vmatprep.mubr.msk.f32.mxu1 %vm4190_vm0, %v4189_v0 }
 0xae4   : > { %3474 = vmatprep.subr.mxu1 %v4189_v0  ;;  %v2414_v63 = vmul.f32 %v3731_v62, %v3723_v47  ;;  %v3273_v47 = vld [vmem:[#allocation19] ss:$0 sm:$0xff] }
 0xae6   : > { %3467 = vmatmul.mubr.msk.f32.vlgmr.msra.gmra.mxu1 %vm1024_vm2, %v2414_v63 }
 0xae7   : > { %v3733_v2 = vpop.eup %3732  ;;  %3475 = vmatpush3.msra.mxu1 %v2583_v1  ;;  %3476 = vmatprep.mubr.msk.f32.mxu1 %vm4190_vm0, %v4189_v0 }
 0xae8   : > { %v2581_v3 = vmul.f32 %v3733_v2, %v3725_v49  ;;  %3490 = vmatprep.subr.mxu1 %v4189_v0 }
 0xaea   : > { %3477 = vmatmul.mubr.msk.f32.vlgmr.msra.gmra.mxu1 %vm1024_vm2, %v2581_v3 }
 0xaeb   : > { %3498 = vmatprep.mubr.msk.f32.mxu1 %vm4190_vm0, %v4189_v0  ;;  %3491 = vmatpush3.msra.mxu1 %v2790_v34 }
 0xaec   : > { %3492 = vmatprep.subr.mxu1 %v4189_v0 }
 0xaed   : > { %3493 = vmatpush3.msra.mxu1 %v2789_v35 }
 0xaee   : > { %3494 = vmatprep.subr.mxu1 %v4189_v0 }
 0xaef   : > { %3495 = vmatpush3.msra.mxu1 %v2788_v36 }
 0xaf0   : > { %3496 = vmatprep.subr.mxu1 %v4189_v0 }
 0xb3a   : > { %v2153_v4 = vpop.f32.mrf.mxu1 }
 0xb3c   : > { %v3448_v6 = vpop.f32.mrf.mxu1 }
 0xba2   : > { %v2320_v11 = vpop.f32.mrf.mxu1 }
 0xba3   : > { %2659 = vrot.lane.b32.xlu0 %v2320_v11, %s5049_s16  ;;  %v3278_v11 = vld [vmem:[%s5053_s10] ss:$0 sm:$0xff]  ;;  %s4084_s10 = sshll.u32 %s4205_s23, 4  ;;  %s4085_s10 = int_to_ptr.vmem [resolvable:$false] %s4084_s10 }
 0xba4   : > { %v3458_v12 = vpop.f32.mrf.mxu1  ;;  %p4087_p4 = scmp.lt.s32.totalorder %s3007_s30, %s4085_s10 }
 0xba6   : > { %v2487_v13 = vpop.f32.mrf.mxu1 }
 0xba7   : > { %2663 = vrot.lane.b32.xlu1 %v2487_v13, %s5050_s13  ;;  %s5054_s13 = sld [smem:[#allocation54_spill]] }
 0xba8   : > { %v3468_v14 = vpop.f32.mrf.mxu1 }
 0xbaa   : > { %v2654_v15 = vpop.f32.mrf.mxu1 }
 0xbab   : > { %2667 = vrot.lane.b32.xlu0 %v2654_v15, %s5051_s14  ;;  %s3281_s14 = sshll.u32 %s4352_s29, 7  ;;  %s4086_s29 = scalar_lea.vmem %s4085_s10, 256 }
 0xbac   : > { %v3478_v16 = vpop.f32.mrf.mxu1  ;;  %s3004_s8 = scalar_lea.hbm %s5055_s24, %s3281_s14  ;;  %p4088_p3 = scmp.lt.s32.totalorder %s4086_s29, %s4080_s17 }
 0xbad   : > { %v3279_v13 = vld [vmem:[%s5054_s13] ss:$0 sm:$0xff] }
 0xbae   : > { %p4089_p0 = por %p4088_p3, %p4087_p4 }
 0xbb0   : > { %p4090_p2 = pnand %p4089_p0, %p4083_p10 }
 0xc15   : > { %v2660_v17 = vpop.permute.xlu0 %2659 }
 0xc16   : > { %v2670_v19 = vsel %vm1024_vm2, %v2153_v4, %v2660_v17 }
 0xc19   : > { %v2664_v18 = vpop.permute.xlu1 %2663 }
 0xc1a   : > { %v2671_v20 = vsel %vm1703_vm4, %v2670_v19, %v2664_v18 }
 0xc1d   : > { %v2668_v21 = vpop.permute.xlu0 %2667 }
 0xc1e   : > { %v2672_v22 = vsel %vm1705_vm5, %v2671_v20, %v2668_v21 }
 0xc1f   : > { %3488 = vmatmul.mubr.msk.f32.vlgmr.msra.gmra.mxu0 %vm946_vm1, %v2672_v22 }
 0xc20   : > { %3517 = vmatprep.mubr.msk.f32.mxu0 %vm4190_vm0, %v4189_v0  ;;  %3502 = vmatpush3.msra.mxu0 %v2879_v37 }
 0xc21   : > { %3503 = vmatprep.subr.mxu0 %v4189_v0 }
 0xc22   : > { %3504 = vmatpush3.msra.mxu0 %v2878_v38 }
 0xc23   : > { %3505 = vmatprep.subr.mxu0 %v4189_v0 }
 0xc24   : > { %3506 = vmatpush3.msra.mxu0 %v2877_v39 }
 0xc25   : > { %3507 = vmatprep.subr.mxu0 %v4189_v0 }
 0xc26   : > { %3508 = vmatpush3.msra.mxu0 %v2876_v40 }
 0xc27   : > { %3509 = vmatprep.subr.mxu0 %v4189_v0 }
 0xc28   : > { %3510 = vmatpush3.msra.mxu0 %v2875_v41 }
 0xc29   : > { %3511 = vmatprep.subr.mxu0 %v4189_v0 }
 0xc2a   : > { %3512 = vmatpush3.msra.mxu0 %v2874_v50 }
 0xc2b   : > { %3513 = vmatprep.subr.mxu0 %v4189_v0 }
 0xc2c   : > { %3514 = vmatpush3.msra.mxu0 %v2873_v51 }
 0xc2d   : > { %3515 = vmatprep.subr.mxu0 %v4189_v0 }
 0xc2e   : > { %3516 = vmatpush3.msra.mxu0 %v2872_v52 }
 0xcdf   : > { %v2753_v24 = vpop.f32.mrf.mxu0 }
 0xce0   : > { %v2754_v25 = vadd.f32 %v3270_v23, %v2753_v24 }
 0xce1   : > { %v3489_v26 = vpop.f32.mrf.mxu0 }
 0xce2   : > { %v2759_v27 = vadd.f32 %v2754_v25, %v4761_v57  ;;  %v2787_v57 = vld [vmem:[#allocation20] sm:$0xff] }
 0xce3   : > { %3497 = vmatpush3.msra.mxu1 %v2787_v57 }
 0xce4   : > { %v2760_v28 = vsel %vm946_vm1, %v2759_v27, 0.0 }
 0xce5   : > { %2761 = vadd.xlane.f32.xlu1 %v2760_v28 }
 0xd6e   : > { %v2762_v29 = vpop.xlane.xlu1 %2761 }
 0xd6f   : > { %v2763_v30 = vmul.f32 0.03125, %v2762_v29 }
 0xd71   : > { %v2764_v31 = vsub.f32 %v2759_v27, %v2763_v30 }
 0xd73   : > { %v2765_v32 = vmul.f32 %v2764_v31, %v2764_v31 }
 0xd75   : > { %v2766_v33 = vsel %vm946_vm1, %v2765_v32, 0.0 }
 0xd76   : > { %2767 = vadd.xlane.f32.xlu0 %v2766_v33 }
 0xdff   : > { %v2768_v42 = vpop.xlane.xlu0 %2767 }
 0xe00   : > { %v2769_v5 = vmul.f32 0.03125, %v2768_v42 }
 0xe02   : > { %v2770_v43 = vadd.f32 1e-05, %v2769_v5 }
 0xe04   : > { %3734 = vrsqrt.f32 %v2770_v43 }
 0xe11   : > { %v3735_v44 = vpop.eup %3734 }
 0xe12   : > { %v2772_v46 = vmul.f32 %v3735_v44, %v2764_v31 }
 0xe14   : > { %v2779_v48 = vmul.f32 %v3272_v45, %v2772_v46 }
 0xe16   : > { %v2786_v49 = vadd.f32 %v3273_v47, %v2779_v48 }
 0xe18   : > { %3499 = vmatmul.mubr.msk.f32.vlgmr.msra.gmra.mxu1 %vm946_vm1, %v2786_v49 }
 0xed8   : > { %v2867_v54 = vpop.f32.mrf.mxu1 }
 0xed9   : > { %v2868_v55 = vadd.f32 %v3274_v53, %v2867_v54 }
 0xeda   : > { %v3500_v56 = vpop.f32.mrf.mxu1 }
 0xedb   : > { %v2871_v58 = vmax.f32 %v2868_v55, 0.0 }
 0xedd   : > { %3518 = vmatmul.mubr.msk.f32.vlgmr.msra.gmra.mxu0 %vm2887_vm7, %v2871_v58 }
 0xf9d   : > { %v2957_v60 = vpop.f32.mrf.mxu0 }
 0xf9e   : > { %v2958_v61 = vadd.f32 %v3276_v59, %v2957_v60 }
 0xf9f   : > { %v3519_v62 = vpop.f32.mrf.mxu0 }
 0xfa0   : > { %v2963_v63 = vadd.f32 %v2958_v61, %v2786_v49 }
 0xfa2   : > { %v2964_v1 = vsel %vm946_vm1, %v2963_v63, 0.0 }
 0xfa3   : > { %2965 = vadd.xlane.f32.xlu0 %v2964_v1 }
0x102c   : > { %v2966_v0 = vpop.xlane.xlu0 %2965 }
0x102d   : > { %v2967_v2 = vmul.f32 0.03125, %v2966_v0 }
0x102f   : > { %v2968_v3 = vsub.f32 %v2963_v63, %v2967_v2 }
0x1031   : > { %v2969_v4 = vmul.f32 %v2968_v3, %v2968_v3 }
0x1033   : > { %v2970_v6 = vsel %vm946_vm1, %v2969_v4, 0.0 }
0x1034   : > { %2971 = vadd.xlane.f32.xlu1 %v2970_v6 }
0x10bd   : > { %v2972_v7 = vpop.xlane.xlu1 %2971 }
0x10be   : > { %v2973_v8 = vmul.f32 0.03125, %v2972_v7 }
0x10c0   : > { %v2974_v9 = vadd.f32 1e-05, %v2973_v8 }
0x10c2   : > { %3736 = vrsqrt.f32 %v2974_v9 }
0x10cf   : > { %v3737_v10 = vpop.eup %3736 }
0x10d0   : > { %v2976_v12 = vmul.f32 %v3737_v10, %v2968_v3 }
0x10d2   : > { %v2983_v14 = vmul.f32 %v3278_v11, %v2976_v12 }
0x10d4   : > { %v2990_v15 = vadd.f32 %v3279_v13, %v2983_v14 }
0x10d6   : > { %2991 = vst.msk [vmem:[%s932_s7] sm:$0xff] %vm946_vm1, %v2990_v15 }
0x10d7   : > { %4093 = shalt.err (!%p4090_p2)
}
0x10d8   : > { %s4094_s19 = scalar_lea.hbm %s3004_s8, 128  ;;  %s4098_s16 = scalar_lea.hbm %s5055_s24, 256 }
0x10d9   : > { %p4095_p8 = scmp.ne.s32.totalorder %s3004_s8, %s4094_s19  ;;  %p4099_p13 = scmp.lt.s32.totalorder %s3004_s8, %s5055_s24 }
0x10da   : > { %p4100_p1 = scmp.lt.s32.totalorder %s4098_s16, %s4094_s19 }
0x10db   : > { %p4096_p9 = pnand %p4095_p8, %p5056_p7 }
0x10dc   : > { %p4101_p5 = por %p4100_p1, %p4099_p13 }
0x10dd   : > { %p4097_p12 = pneg %p4096_p9 }
0x10df   : > { %p4102_p6 = pnand %p4101_p5, %p4097_p12 }
0x10e1   : > { %4105 = shalt.err (!%p4102_p6)
}
0x10e2   : > { %3568 = dma.vmem_to_hbm [thread:$0]  (%p5056_p7), %s3007_s30, 128, %s3004_s8, %s2993_s2  }
0x10e3 PF: > { %s3018_s7 = sand.u32 1, %s4160_s5   ;;  %p5057_p11 = scmp.ne.s32.totalorder %s5024_s1, 0 }
0x10e4   : > { %p5058_p10 = scmp.ge.s32.totalorder %s4172_s28, 2  ;;  %s3019_s4 = scalar_lea.sflag [#allocation4], %s3018_s7 }
0x10e6   : > { %p3612_p4 = pnand %p5058_p10, %p5057_p11 }
0x10e8   : > { %p3613_p3 = pneg %p3612_p4 }
0x10ea   : > { %4155 = dma.done.wait (%p3613_p3), %s3019_s4, 128  }
0x10eb   : > { %4157 = vsyncadd (%p3613_p3), %s3019_s4, 4294967168  ;;  %s5059_s0 = sld [smem:[#allocation33_spill]]  ;;  %p45_p0 = scmp.ge.s32.totalorder %s4471_s3, 4  }
0x10ec   : > { %s5060_s5 = smov %s4164_s26  ;;  %s5061_s26 = smov %s4168_s27 }
0x10ed   : > { %s5063_s28 = smov %s4471_s3  ;;  %47 = sbr.rel (!%p45_p0) target bundleno = 35 (0x23), region = 218 }
0x10f1   : > { %s5062_s27 = smov %s5059_s0 }
0x10f2   :  { %3024 = vsyncpa [#allocation3], 1 }
0x10f3   :  { %3026 = vsyncpa [#allocation3 + $0x1], 1 }
0x10f4   :  { %3027 = vsyncpa [#allocation6], 1 }
0x10f5   :  { %3029 = vsyncpa [#allocation6 + $0x1], 1 }
0x10f6   :  { %3030 = vsyncpa [#allocation9], 1 }
0x10f7   :  { %3031 = vsyncpa [#allocation12], 1 }
0x10f8   :  { %3032 = vsyncpa [#allocation15], 1 }
0x10f9   :  { %3033 = vsyncpa [#allocation18], 1 }
0x10fa   :  { %3034 = vsyncpa [#allocation21], 1 }
0x10fb   :  { %3035 = vsyncpa [#allocation4], 1 }
0x10fc   :  { %3037 = vsyncpa [#allocation4 + $0x1], 1 }

</bundles_post_ra>
